<compile_context>
chip_gen: v7x
topology: tpu7x:2x2x1
jax: 0.10.0
libtpu: 0.0.40
codegen_flags: <defaults>
</compile_context>

<pallas_src>
import functools

import jax
import jax.numpy as jnp
from jax.experimental import pallas as pl
from jax.experimental.pallas import tpu as pltpu


def _round_up(x, m):
    return ((x + m - 1) // m) * m


def _largest_divisor_leq(n, cap):
    cap = max(1, min(n, cap))
    for d in range(cap, 0, -1):
        if n % d == 0:
            return d
    return 1


def _pick_row_tile(R, C, itemsize=4, max_bytes=2 << 20, max_rows=8192):
    """Row tile (multiple of 8) for an (R, C) elementwise kernel; >=2 blocks
    when cheaply possible so both v7x TensorCores get work."""
    tr = max_bytes // max(1, C * itemsize)
    tr = max(8, min(max_rows, tr))
    tr = max(8, (tr // 8) * 8)
    R8 = _round_up(R, 8)
    if tr >= R8:
        if R8 >= 16 and R8 % 16 == 0:
            return R8 // 2, R8
        return R8, R8
    return tr, _round_up(R, tr)


# ----------------------------------------------------------------------------
# Pallas kernels
# ----------------------------------------------------------------------------

def _matmul_bias_kernel(a_ref, b_ref, bias_ref, o_ref, acc_ref, *, apply_relu):
    k = pl.program_id(2)

    @pl.when(k == 0)
    def _():
        acc_ref[...] = jnp.zeros_like(acc_ref)

    # a/b are already bf16 (cast in the wrapper) -> no per-step VPU casts here.
    acc_ref[...] += jnp.dot(a_ref[...], b_ref[...],
                            preferred_element_type=jnp.float32)

    @pl.when(k == pl.num_programs(2) - 1)
    def _():
        out = acc_ref[...] + bias_ref[...]
        if apply_relu:
            out = jnp.maximum(out, 0.0)
        o_ref[...] = out.astype(o_ref.dtype)


def _maxpool_kernel(x_ref, o_ref):
    # x_ref: (g, 2, Wo, 2*C) row blocks of the original map; o_ref: (g, Wo, C)
    C = o_ref.shape[-1]
    v = jnp.maximum(x_ref[:, 0, :, :], x_ref[:, 1, :, :])      # vertical max
    o_ref[...] = jnp.maximum(v[:, :, :C], v[:, :, C:])          # horizontal max


def _upadd_kernel(lo_ref, hi_ref, o_ref):
    # lo_ref: (g, Wl, C) low-res rows; hi_ref/o_ref: (g, 2, Wl, 2*C)
    lo = lo_ref[...]
    lo2 = jnp.concatenate([lo, lo], axis=-1)          # nearest 2x in width
    o_ref[...] = hi_ref[...] + lo2[:, None, :, :]     # nearest 2x in height + add


def _l2norm_kernel(x_ref, w_ref, o_ref):
    x = x_ref[...]
    ssq = jnp.sum(x * x, axis=-1, keepdims=True)
    inv = 1.0 / (jnp.sqrt(ssq) + 1e-10)
    o_ref[...] = x * (w_ref[...] * inv)


def _relu_kernel(x_ref, o_ref):
    o_ref[...] = jnp.maximum(x_ref[...], 0.0)


# ----------------------------------------------------------------------------
# Pallas wrappers
# ----------------------------------------------------------------------------

def _matmul_tiles(M, K, N):
    """Pick (tm, tn, tk, Mp, Np, Kp).  VMEM budget sized for v7x (64 MiB phys)."""
    Kp = _round_up(K, 128)
    Np = _round_up(N, 128)

    # N tile: as wide as divisibility allows (lane-dense stores, fewer A re-reads)
    if Np % 512 == 0:
        tn = 512
    elif Np % 256 == 0:
        tn = 256
    else:
        tn = 128

    # K tile: fewer K-steps for the small-M (latency-bound) head/extras matmuls.
    k_cap = 2048 if M <= 1024 else 512
    if Kp <= k_cap:
        tk = Kp
    else:
        tk = 128
        d = 256
        while d <= k_cap:
            if Kp % d == 0:
                tk = d
            d += 128

    # M tile: as big as a 26 MiB budget allows (A bf16 x2 buf, B bf16 x2 buf,
    # out f32 x2 buf, f32 acc scratch), capped at 1024 rows.
    budget = 26 * 1024 * 1024
    fixed = 2 * tk * tn * 2 + 2 * tn * 4
    per_row = 2 * tk * 2 + 2 * tn * 4 + tn * 4
    tm_cap = max(8, ((budget - fixed) // per_row) // 8 * 8)
    tm = min(1024, tm_cap, _round_up(M, 8))
    tm = max(8, (tm // 8) * 8)
    Mp = _round_up(M, tm)

    # Keep >=2 blocks along a parallel axis so both v7x TensorCores get work.
    if Mp // tm == 1 and Np // tn == 1:
        if tn >= 256:
            tn //= 2
        elif Mp > 8:
            tm = max(8, _round_up(Mp // 2, 8))
            Mp = _round_up(M, tm)
    return tm, tn, tk, Mp, Np, Kp


def matmul_bias(a, b, bias, *, relu):
    """(M,K) @ (K,N) + bias[, ReLU]; tiled over M, N, K; bf16 MXU, f32 acc."""
    M, K = a.shape
    _, N = b.shape
    tm, tn, tk, Mp, Np, Kp = _matmul_tiles(M, K, N)

    a_p = a.astype(jnp.bfloat16)            # cast in wrapper: halves A-tile DMA
    if (Mp, Kp) != (M, K):
        a_p = jnp.pad(a_p, ((0, Mp - M), (0, Kp - K)))
    b_p = b
    if (Kp, Np) != (K, N):
        b_p = jnp.pad(b_p, ((0, Kp - K), (0, Np - N)))
    b_p = b_p.astype(jnp.bfloat16)
    bias_p = bias
    if Np != N:
        bias_p = jnp.pad(bias_p, (0, Np - N))
    bias_p = bias_p.reshape(1, Np).astype(jnp.float32)

    out = pl.pallas_call(
        functools.partial(_matmul_bias_kernel, apply_relu=relu),
        out_shape=jax.ShapeDtypeStruct((Mp, Np), jnp.float32),
        grid_spec=pltpu.PrefetchScalarGridSpec(
            num_scalar_prefetch=0,
            grid=(Mp // tm, Np // tn, Kp // tk),
            in_specs=[
                pl.BlockSpec((tm, tk), lambda i, j, k: (i, k)),
                pl.BlockSpec((tk, tn), lambda i, j, k: (k, j)),
                pl.BlockSpec((1, tn), lambda i, j, k: (0, j)),
            ],
            out_specs=pl.BlockSpec((tm, tn), lambda i, j, k: (i, j)),
            scratch_shapes=[pltpu.VMEM((tm, tn), jnp.float32)],
        ),
        compiler_params=pltpu.CompilerParams(
            dimension_semantics=("parallel", "parallel", "arbitrary"),
            vmem_limit_bytes=40 * 1024 * 1024),
    )(a_p, b_p, bias_p)
    if (Mp, Np) != (M, N):
        out = out[:M, :N]
    return out


@functools.partial(jax.jit, static_argnames=("stride", "padding", "relu"))
def conv2d(x, w, b, *, stride=1, padding=0, relu=False):
    """NHWC conv via im2col (glue, bf16) + tiled Pallas matmul (hot path)."""
    N, H, W, Cin = x.shape
    KH, KW, _, Cout = w.shape
    Ho = (H + 2 * padding - KH) // stride + 1
    Wo = (W + 2 * padding - KW) // stride + 1
    if KH == 1 and KW == 1 and padding == 0 and stride == 1:
        a = x.reshape(N * H * W, Cin)
    else:
        # TODO(synk): replace the HBM im2col materialization with a halo-DMA
        # direct-conv Pallas kernel (accumulate over the KH*KW taps in-kernel);
        # the bf16 cast already halves the im2col traffic.
        xp = jnp.pad(x.astype(jnp.bfloat16),
                     ((0, 0), (padding, padding), (padding, padding), (0, 0)))
        cols = [xp[:, kh:kh + stride * Ho:stride, kw:kw + stride * Wo:stride, :]
                for kh in range(KH) for kw in range(KW)]
        a = jnp.concatenate(cols, axis=-1).reshape(N * Ho * Wo, KH * KW * Cin)
    out = matmul_bias(a, w.reshape(KH * KW * Cin, Cout), b, relu=relu)
    return out.reshape(N, Ho, Wo, Cout)


@jax.jit
def maxpool_2x2(x):
    """Fused 2x2/stride-2 max pool: one read of x, one write of the output.

    ('C' ceil-mode pooling is identical to 'M' for even H, W.)
    """
    N, H, W, C = x.shape
    assert H % 2 == 0 and W % 2 == 0
    Ho, Wo = H // 2, W // 2
    R = N * Ho
    x4 = x.reshape(R, 2, Wo, 2 * C)              # free row-major reshape
    row_bytes = 2 * W * C * 4
    cap = max(1, (2 << 20) // row_bytes)
    if R >= 2:
        cap = min(cap, max(1, R // 2))           # >=2 grid blocks (megacore)
    g = _largest_divisor_leq(R, cap)
    out = pl.pallas_call(
        _maxpool_kernel,
        out_shape=jax.ShapeDtypeStruct((R, Wo, C), jnp.float32),
        grid=(R // g,),
        in_specs=[pl.BlockSpec((g, 2, Wo, 2 * C), lambda i: (i, 0, 0, 0))],
        out_specs=pl.BlockSpec((g, Wo, C), lambda i: (i, 0, 0)),
        compiler_params=pltpu.CompilerParams(
            dimension_semantics=("parallel",)),
    )(x4)
    return out.reshape(N, Ho, Wo, C)


@jax.jit
def upsample2x_add(lo, hi):
    """out = nearest_upsample_2x(lo) + hi, fully fused (the upsampled tensor is
    never materialized in HBM; width dup = in-kernel lane concat, height dup =
    in-kernel broadcast)."""
    N, Hl, Wl, C = lo.shape
    Nh, H, W, Ch = hi.shape
    assert Nh == N and H == 2 * Hl and W == 2 * Wl and Ch == C
    R = N * Hl
    lo3 = lo.reshape(R, Wl, C)
    hi4 = hi.reshape(R, 2, Wl, 2 * C)            # free row-major reshape
    row_bytes = 9 * Wl * C * 4
    cap = max(1, (2 << 20) // row_bytes)
    if R >= 2:
        cap = min(cap, max(1, R // 2))
    g = _largest_divisor_leq(R, cap)
    out = pl.pallas_call(
        _upadd_kernel,
        out_shape=jax.ShapeDtypeStruct((R, 2, Wl, 2 * C), jnp.float32),
        grid=(R // g,),
        in_specs=[pl.BlockSpec((g, Wl, C), lambda i: (i, 0, 0)),
                  pl.BlockSpec((g, 2, Wl, 2 * C), lambda i: (i, 0, 0, 0))],
        out_specs=pl.BlockSpec((g, 2, Wl, 2 * C), lambda i: (i, 0, 0, 0)),
        compiler_params=pltpu.CompilerParams(
            dimension_semantics=("parallel",)),
    )(lo3, hi4)
    return out.reshape(N, H, W, C)


@jax.jit
def l2norm(x, weight):
    """out = weight * x / (||x||_2 over channels + 1e-10), per pixel (row-tiled)."""
    N, H, W, C = x.shape
    R = N * H * W
    tr, Rp = _pick_row_tile(R, C)
    xf = x.reshape(R, C)
    if Rp != R:
        xf = jnp.pad(xf, ((0, Rp - R), (0, 0)))
    out = pl.pallas_call(
        _l2norm_kernel,
        out_shape=jax.ShapeDtypeStruct((Rp, C), jnp.float32),
        grid=(Rp // tr,),
        in_specs=[pl.BlockSpec((tr, C), lambda i: (i, 0)),
                  pl.BlockSpec((1, C), lambda i: (0, 0))],
        out_specs=pl.BlockSpec((tr, C), lambda i: (i, 0)),
        compiler_params=pltpu.CompilerParams(
            dimension_semantics=("parallel",)),
    )(xf, weight.reshape(1, C))
    if Rp != R:
        out = out[:R]
    return out.reshape(N, H, W, C)


@jax.jit
def relu_pallas(x):
    """Standalone ReLU (normally fused into the preceding conv)."""
    shape = x.shape
    size = 1
    for s in shape:
        size *= s
    C = shape[-1]
    if C < 128 and size % 128 == 0:
        C = 128                                   # lane-dense stores
    R = size // C
    xf = x.reshape(R, C)
    tr, Rp = _pick_row_tile(R, C)
    if Rp != R:
        xf = jnp.pad(xf, ((0, Rp - R), (0, 0)))
    out = pl.pallas_call(
        _relu_kernel,
        out_shape=jax.ShapeDtypeStruct((Rp, C), jnp.float32),
        grid=(Rp // tr,),
        in_specs=[pl.BlockSpec((tr, C), lambda i: (i, 0))],
        out_specs=pl.BlockSpec((tr, C), lambda i: (i, 0)),
        compiler_params=pltpu.CompilerParams(
            dimension_semantics=("parallel",)),
    )(xf)
    if Rp != R:
        out = out[:R]
    return out.reshape(shape)


# ----------------------------------------------------------------------------
# Parameters (deterministic, synthetic)
# ----------------------------------------------------------------------------

def conv_params(key, kh, kw, cin, cout):
    fan_in = kh * kw * cin
    w = jax.random.normal(key, (kh, kw, cin, cout), dtype=jnp.float32)
    w = w * jnp.sqrt(2.0 / fan_in)
    b = jnp.zeros((cout,), jnp.float32)
    return w, b


def build_vgg_layers(key):
    cfg = [64, 64, 'M', 128, 128, 'M', 256, 256, 256, 'C',
           512, 512, 512, 'M', 512, 512, 512]
    layers = []
    in_c = 3
    ki = 0
    for v in cfg:
        if v in ('M', 'C'):
            layers.append(('pool',))   # 'C' (ceil) == 'M' for even spatial dims
        else:
            w, b = conv_params(jax.random.fold_in(key, ki), 3, 3, in_c, v)
            ki += 1
            layers.append(('conv3', w, b))
            layers.append(('relu',))
            in_c = v
    # pool5 / conv6 / conv7 (see layout NOTE at top of file)
    layers.append(('pool',))
    w, b = conv_params(jax.random.fold_in(key, 100), 3, 3, 512, 1024)
    layers.append(('conv3', w, b))
    layers.append(('relu',))
    w, b = conv_params(jax.random.fold_in(key, 101), 1, 1, 1024, 1024)
    layers.append(('conv1', w, b))
    layers.append(('relu',))
    assert len(layers) == 35
    return layers


def run_vgg_segment(layers, x, start, end):
    k = start
    while k < end:
        kind = layers[k][0]
        if kind == 'pool':
            x = maxpool_2x2(x)
            k += 1
        elif kind == 'relu':
            x = relu_pallas(x)
            k += 1
        else:
            _, w, b = layers[k]
            pad = 1 if kind == 'conv3' else 0
            fuse = (k + 1 < end) and (layers[k + 1][0] == 'relu')
            x = conv2d(x, w, b, stride=1, padding=pad, relu=fuse)
            k += 2 if fuse else 1
    return x


def make_priors(feature_sizes, mbox):
    # TODO(synk): exact PriorBox 'v2' config not provided; deterministic stand-in
    # with the correct (num_priors, 4) shape / per-cell ordering.
    priors = []
    nk = len(feature_sizes)
    for k, (f, m) in enumerate(zip(feature_sizes, mbox)):
        s = (k + 1.0) / (nk + 1.0)
        for i in range(f):
            for j in range(f):
                cx = (j + 0.5) / f
                cy = (i + 0.5) / f
                for p in range(m):
                    wp = min(s * (1.0 + 0.15 * p), 1.0)
                    priors.append([cx, cy, wp, wp])
    return jnp.asarray(priors, dtype=jnp.float32)


def build_params(key, *, image_size, num_classes):
    p = {}
    p['vgg'] = build_vgg_layers(jax.random.fold_in(key, 0))
    p['w_l2norm3'] = jnp.full((256,), 10.0, jnp.float32)
    p['w_l2norm4'] = jnp.full((512,), 8.0, jnp.float32)
    p['w_l2norm5'] = jnp.full((512,), 5.0, jnp.float32)

    kk = jax.random.fold_in(key, 1)
    p['cnn512_256'] = conv_params(jax.random.fold_in(kk, 0), 1, 1, 512, 256)
    p['cnn512'] = conv_params(jax.random.fold_in(kk, 1), 1, 1, 512, 512)
    p['cnn512_2'] = conv_params(jax.random.fold_in(kk, 2), 3, 3, 512, 512)
    p['cnn256'] = conv_params(jax.random.fold_in(kk, 3), 3, 3, 256, 256)
    p['cnn1024_512'] = conv_params(jax.random.fold_in(kk, 4), 1, 1, 1024, 512)
    # cnn4/cnn1/cnn2/cnn3 exist in __init__ but are unused in forward -> omitted.

    # extras '640' config [256,'S',512,128,'S',256] from 1024 channels:
    ke = jax.random.fold_in(key, 2)
    e0 = conv_params(jax.random.fold_in(ke, 0), 1, 1, 1024, 256)
    e1 = conv_params(jax.random.fold_in(ke, 1), 3, 3, 256, 512)
    e2 = conv_params(jax.random.fold_in(ke, 2), 1, 1, 512, 128)
    e3 = conv_params(jax.random.fold_in(ke, 3), 3, 3, 128, 256)
    p['extras'] = [(e0[0], e0[1], 1, 0), (e1[0], e1[1], 2, 1),
                   (e2[0], e2[1], 1, 0), (e3[0], e3[1], 2, 1)]

    # multibox head (one loc + one conf 3x3 conv per source)
    src_channels = [256, 512, 512, 1024, 512, 256]
    mbox = [4, 6, 6, 6, 4, 4]
    kh = jax.random.fold_in(key, 3)
    p['loc'] = [conv_params(jax.random.fold_in(kh, 2 * i), 3, 3, c, m * 4)
                for i, (c, m) in enumerate(zip(src_channels, mbox))]
    p['conf'] = [conv_params(jax.random.fold_in(kh, 2 * i + 1), 3, 3, c,
                             m * num_classes)
                 for i, (c, m) in enumerate(zip(src_channels, mbox))]

    # prior boxes (shapes follow the actual source feature-map sizes)
    f = image_size // 4
    fsizes = [f, f // 2, f // 4, f // 8]
    f = fsizes[-1]
    for _ in range(2):
        f = (f + 2 - 3) // 2 + 1
        fsizes.append(f)
    p['priors'] = make_priors(fsizes, mbox)
    return p


# ----------------------------------------------------------------------------
# SSD forward ('train' phase)
# ----------------------------------------------------------------------------

def ssd_forward(params, x_nchw, *, num_classes):
    x = jnp.transpose(x_nchw, (0, 2, 3, 1)).astype(jnp.float32)  # NCHW -> NHWC
    vgg = params['vgg']

    pre_sources = []
    x = run_vgg_segment(vgg, x, 0, 16)
    pre_sources.append(l2norm(x, params['w_l2norm3']))
    x = run_vgg_segment(vgg, x, 16, 23)
    pre_sources.append(l2norm(x, params['w_l2norm4']))
    x = run_vgg_segment(vgg, x, 23, 30)
    pre_sources.append(l2norm(x, params['w_l2norm5']))
    x = run_vgg_segment(vgg, x, 30, len(vgg))
    pre_sources.append(x)

    sources = []
    for i in range(3):
        if i == 0:
            w, b = params['cnn512_256']
            s = conv2d(pre_sources[1], w, b, padding=0)
            src = upsample2x_add(s, pre_sources[0])
            w, b = params['cnn256']
            src = conv2d(src, w, b, padding=1)
        elif i == 1:
            w, b = params['cnn512']
            s = conv2d(pre_sources[2], w, b, padding=0)
            src = upsample2x_add(s, pre_sources[1])
            w, b = params['cnn512_2']
            src = conv2d(src, w, b, padding=1)
        else:
            w, b = params['cnn1024_512']
            s = conv2d(pre_sources[3], w, b, padding=0)
            src = upsample2x_add(s, pre_sources[2])
            w, b = params['cnn512_2']
            src = conv2d(src, w, b, padding=1)
        sources.append(src)
    sources.append(x)

    for k, (w, b, st, pd) in enumerate(params['extras']):
        x = conv2d(x, w, b, stride=st, padding=pd, relu=True)
        if k % 2 == 1:
            sources.append(x)

    # Multibox head: loc and conf share the same 3x3/pad-1 conv on each source,
    # so merge them into one conv (concat Cout) and split the channels after.
    loc_parts, conf_parts = [], []
    for src, (lw, lb), (cw, cb) in zip(sources, params['loc'], params['conf']):
        n_loc = lw.shape[-1]
        wcat = jnp.concatenate([lw, cw], axis=-1)
        bcat = jnp.concatenate([lb, cb], axis=0)
        y = conv2d(src, wcat, bcat, padding=1)   # NHWC == permute(0,2,3,1)
        l = y[..., :n_loc]
        c = y[..., n_loc:]
        loc_parts.append(l.reshape(l.shape[0], -1))
        conf_parts.append(c.reshape(c.shape[0], -1))
    loc = jnp.concatenate(loc_parts, axis=1)
    conf = jnp.concatenate(conf_parts, axis=1)

    # 'train' phase output. TODO(synk): 'test' phase Detect (NMS) + softmax
    # post-processing is sequential/data-dependent and is not implemented.
    return (loc.reshape(loc.shape[0], -1, 4),
            conf.reshape(conf.shape[0], -1, num_classes),
            params['priors'])


# ----------------------------------------------------------------------------

if __name__ == "__main__":
    key = jax.random.PRNGKey(0)
    batch = 2
    image_size = 64          # must be a multiple of 32 for the VGG trunk
    num_classes = 4

    params = build_params(key, image_size=image_size, num_classes=num_classes)
    x = jax.random.normal(jax.random.fold_in(key, 999),
                          (batch, 3, image_size, image_size), dtype=jnp.float32)

    loc, conf, priors = ssd_forward(params, x, num_classes=num_classes)
    jax.block_until_ready((loc, conf, priors))

    n_priors = priors.shape[0]
    assert loc.shape == (batch, n_priors, 4)
    assert conf.shape == (batch, n_priors, num_classes)
    assert priors.shape == (n_priors, 4)
    assert bool(jnp.all(jnp.isfinite(loc))) and bool(jnp.all(jnp.isfinite(conf)))

    print("KERNEL_OK")
</pallas_src>

<mosaic_0001>
module attributes {stable_mosaic.version = 11 : i64} {
  func.func @_matmul_bias_kernel(%arg0: i32, %arg1: i32, %arg2: i32, %arg3: memref<1024x128xbf16, #tpu.memory_space<vmem>>, %arg4: memref<128x128xbf16, #tpu.memory_space<vmem>>, %arg5: memref<1x128xf32, #tpu.memory_space<vmem>>, %arg6: memref<1024x128xf32, #tpu.memory_space<vmem>>, %arg7: memref<1024x128xf32, #tpu.memory_space<vmem>>) attributes {dimension_semantics = [#tpu.dimension_semantics<parallel>, #tpu.dimension_semantics<parallel>, #tpu.dimension_semantics<arbitrary>], iteration_bounds = array<i64: 8, 1, 1>, scalar_prefetch = 0 : i64, scratch_operands = 1 : i64, tpu.core_type = #tpu.core_type<tc>, window_params = [{transform_indices = @transform_0, window_bounds = array<i64: 1024, 128>}, {transform_indices = @transform_1, window_bounds = array<i64: 128, 128>}, {transform_indices = @transform_2, window_bounds = array<i64: 1, 128>}, {transform_indices = @transform_3, window_bounds = array<i64: 1024, 128>}]} {
    %c0_i32 = arith.constant 0 : i32
    %0 = arith.cmpi eq, %arg2, %c0_i32 : i32
    %1 = arith.extui %0 : i1 to i32
    %c0_i32_0 = arith.constant 0 : i32
    %2 = arith.cmpi ne, %1, %c0_i32_0 : i32
    scf.if %2 {
      %cst_10 = arith.constant 0.000000e+00 : f32
      %12 = vector.broadcast %cst_10 : f32 to vector<1024x128xf32>
      %c0_11 = arith.constant 0 : index
      %c0_12 = arith.constant 0 : index
      %13 = vector.load %arg7[%c0_11, %c0_12] : memref<1024x128xf32, #tpu.memory_space<vmem>>, vector<1024x128xf32>
      tpu.vector_store %arg7[%c0_11, %c0_12], %12 {strides = array<i32>} : memref<1024x128xf32, #tpu.memory_space<vmem>>, vector<1024x128xf32>,
    } else {
    }
    %c0 = arith.constant 0 : index
    %c0_1 = arith.constant 0 : index
    %3 = vector.load %arg7[%c0, %c0_1] : memref<1024x128xf32, #tpu.memory_space<vmem>>, vector<1024x128xf32>
    %c0_2 = arith.constant 0 : index
    %c0_3 = arith.constant 0 : index
    %4 = vector.load %arg3[%c0_2, %c0_3] : memref<1024x128xbf16, #tpu.memory_space<vmem>>, vector<1024x128xbf16>
    %c0_4 = arith.constant 0 : index
    %c0_5 = arith.constant 0 : index
    %5 = vector.load %arg4[%c0_4, %c0_5] : memref<128x128xbf16, #tpu.memory_space<vmem>>, vector<128x128xbf16>
    %cst = arith.constant dense<0.000000e+00> : vector<1024x128xf32>
    %6 = tpu.matmul %4, %5, %cst {dimension_numbers = #tpu.dot_dimension_numbers<[1], [0], [0], [1], [0, 0, 1, 1], [], []>} : vector<1024x128xbf16>, vector<128x128xbf16>, vector<1024x128xf32> -> vector<1024x128xf32>
    %7 = arith.addf %3, %6 : vector<1024x128xf32>
    %c0_6 = arith.constant 0 : index
    %c0_7 = arith.constant 0 : index
    %8 = vector.load %arg7[%c0_6, %c0_7] : memref<1024x128xf32, #tpu.memory_space<vmem>>, vector<1024x128xf32>
    tpu.vector_store %arg7[%c0_6, %c0_7], %7 {strides = array<i32>} : memref<1024x128xf32, #tpu.memory_space<vmem>>, vector<1024x128xf32>,
    %c0_i32_8 = arith.constant 0 : i32
    %9 = arith.cmpi eq, %arg2, %c0_i32_8 : i32
    %10 = arith.extui %9 : i1 to i32
    %c0_i32_9 = arith.constant 0 : i32
    %11 = arith.cmpi ne, %10, %c0_i32_9 : i32
    scf.if %11 {
      %c0_10 = arith.constant 0 : index
      %c0_11 = arith.constant 0 : index
      %12 = vector.load %arg7[%c0_10, %c0_11] : memref<1024x128xf32, #tpu.memory_space<vmem>>, vector<1024x128xf32>
      %c0_12 = arith.constant 0 : index
      %c0_13 = arith.constant 0 : index
      %13 = vector.load %arg5[%c0_12, %c0_13] : memref<1x128xf32, #tpu.memory_space<vmem>>, vector<1x128xf32>
      %14 = vector.broadcast %13 : vector<1x128xf32> to vector<1024x128xf32>
      %15 = arith.addf %12, %14 : vector<1024x128xf32>
      %cst_14 = arith.constant 0.000000e+00 : f32
      %16 = vector.broadcast %cst_14 : f32 to vector<1024x128xf32>
      %17 = arith.maximumf %15, %16 : vector<1024x128xf32>
      %c0_15 = arith.constant 0 : index
      %c0_16 = arith.constant 0 : index
      %18 = vector.load %arg6[%c0_15, %c0_16] : memref<1024x128xf32, #tpu.memory_space<vmem>>, vector<1024x128xf32>
      tpu.vector_store %arg6[%c0_15, %c0_16], %17 {strides = array<i32>} : memref<1024x128xf32, #tpu.memory_space<vmem>>, vector<1024x128xf32>,
    } else {
    }
    return
  }
  func.func @transform_0(%arg0: i32, %arg1: i32, %arg2: i32) -> (i32, i32) {
    %c0_i32 = arith.constant 0 : i32
    return %arg0, %arg2 : i32, i32
  }
  func.func @transform_1(%arg0: i32, %arg1: i32, %arg2: i32) -> (i32, i32) {
    %c0_i32 = arith.constant 0 : i32
    return %arg2, %arg1 : i32, i32
  }
  func.func @transform_2(%arg0: i32, %arg1: i32, %arg2: i32) -> (i32, i32) {
    %c0_i32 = arith.constant 0 : i32
    %c0_i32_0 = arith.constant 0 : i32
    return %c0_i32, %arg1 : i32, i32
  }
  func.func @transform_3(%arg0: i32, %arg1: i32, %arg2: i32) -> (i32, i32) {
    %c0_i32 = arith.constant 0 : i32
    return %arg0, %arg1 : i32, i32
  }
}

</mosaic_0001>

<bundles_post_ra>
// kernel: conv2d.1
= control target key start
LH: loop header
LB: loop body
LE: loop exit
PB: predicated region body
PF: predicated region fallthrough
CT: control target
= control target key end

     0   :  { %8 = vsyncpa [#allocation4], 0  ;;  %s3559_s0 = inlined_call_operand.vmem [shape: bf16[8192,128], index: 0, kind: input, shape index: {}]   ;;  %s3560_s1 = inlined_call_operand.vmem [shape: bf16[128,128], index: 1, kind: input, shape index: {}]   ;;  %s3561_s2 = inlined_call_operand.vmem [shape: f32[1,128], index: 2, kind: input, shape index: {}]   ;;  %s3562_s3 = inlined_call_operand.hbm [shape: f32[8192,128], index: 3, kind: output, shape index: {}]  }
   0x1   :  { %10 = vsyncpa [#allocation4 + $0x1], 0  ;;  %s3087_s12 = smov 0   ;;  %s3089_s13 = smov 0  }
   0x2   :  { %s3091_s14 = smov 0   ;;  %s3093_s15 = smov 0  }
   0x3   :  { %s3095_s16 = smov 0   ;;  %s3097_s17 = smov 0  }
   0x4 LB: > { %s2534_s18 = sadd.s32 4294967295, %s3062_s17   ;;  %s2535_s19 = sadd.s32 4294967294, %s3062_s17   ;;  %s3062_s17 = sphi %s3097_s17, %s16_s17   ;;  %s3058_s16 = sphi %s3095_s16, %s3569_s16   ;;  %s3054_s15 = sphi %s3093_s15, %s3568_s15   ;;  %s3050_s14 = sphi %s3091_s14, %s3567_s14   ;;  %s3046_s13 = sphi %s3089_s13, %s3566_s13   ;;  %s3042_s12 = sphi %s3087_s12, %s3565_s12  }
   0x5   : > { %s35_s20 = sadd.s32 1, %s3058_s16  ;;  %s126_s21 = sadd.s32 1, %s3050_s14 }
   0x6   : > { %p37_p0 = scmp.ge.s32.totalorder %s35_s20, 8  ;;  %p136_p1 = scmp.ne.s32.totalorder %s3050_s14, %s3046_s13 }
   0x7   : > { %p137_p2 = scmp.eq.s32.totalorder %s2534_s18, 7  ;;  %p142_p3 = scmp.ne.s32.totalorder %s3046_s13, %s3042_s12 }
   0x8   : > { %s3571_s20 = smov (%p37_p0, %s35_s20), 0  ;;  %p143_p5 = scmp.eq.s32.totalorder %s2535_s19, 7 }
   0x9   : > { %p3127_p4 = por %p137_p2, %p136_p1  ;;  %s121_s23 = ssub.s32 %s3058_s16, %s3571_s20 }
   0xa   : > { %p2540_p6 = scmp.ge.s32.totalorder %s3062_s17, 1  ;;  %p124_p7 = scmp.eq.s32.totalorder %s121_s23, 0 }
   0xb   : > { %p3134_p8 = por %p143_p5, %p142_p3  ;;  %p191_p9 = scmp.lt.s32.totalorder %s3062_s17, 9 }
   0xc   : > { %s3140_s25 = scalar_select %p124_p7, %s3050_s14, %s126_s21  }
   0xd   : > { %p192_p10 = pnand %p2540_p6, %p191_p9 }
   0xe   : > { %v2912_v0 = vld [vmem:[%s3560_s1] sm:$0xff] (!%p192_p10)   ;;  %s2542_s28 = sshll.u32 (!%p192_p10), %s3054_s15, 7  ;;  %v2913_v1 = vld [vmem:[%s3560_s1 + $0x8] sm:$0xff] (!%p192_p10)   ;;  %v2914_v2 = vld [vmem:[%s3560_s1 + $0x10] sm:$0xff] (!%p192_p10)   ;;  %s226_s30 = sand.u32 (!%p192_p10), 1, %s3046_s13  }
   0xf   : > { %195 = sbr.rel (%p192_p10) target bundleno = 401 (0x191), region = 32  ;;  %p230_p11 = scmp.lt.s32.totalorder (!%p192_p10), %s2542_s28, 1023  ;;  %2695 = vmatprep.subr.bf16.mxu0 (!%p192_p10), %v2912_v0  ;;  %2839 = vmatprep.subr.bf16.mxu1 (!%p192_p10), %v2912_v0  ;;  %v2915_v3 = vld [vmem:[%s3560_s1 + $0x18] sm:$0xff] (!%p192_p10)   ;;  %v2916_v6 = vld [vmem:[%s3560_s1 + $0x20] sm:$0xff] (!%p192_p10)   ;;  %v2917_v7 = vld [vmem:[%s3560_s1 + $0x28] sm:$0xff] (!%p192_p10)  }
  0x10   : > { %2696 = vmatpush3.bf16.msra.mxu0 (!%p192_p10), %v2912_v0  ;;  %2847 = vmatpush3.bf16.msra.mxu1 (!%p192_p10), %v2912_v0  ;;  %v2918_v8 = vld [vmem:[%s3560_s1 + $0x30] sm:$0xff] (!%p192_p10)   ;;  %v2919_v9 = vld [vmem:[%s3560_s1 + $0x38] sm:$0xff] (!%p192_p10)   ;;  %s2622_s8 = sshll.u32 (!%p192_p10), %s3054_s15, 14  ;;  %s3513_s18 = scalar_lea.sflag (!%p192_p10), [#allocation4], %s226_s30 }
  0x11   : > { %2697 = vmatprep.subr.bf16.mxu0 (!%p192_p10), %v2913_v1  ;;  %2840 = vmatprep.subr.bf16.mxu1 (!%p192_p10), %v2913_v1  ;;  %s3501_s11 = scalar_lea.hbm (!%p192_p10), %s3562_s3, %s2622_s8  ;;  %s3064_s21 = smov (!%p192_p10), [#allocation3]  }
  0x12   : > { %s2988_s23 = sshll.u32 (!%p192_p10), %s3064_s21, 4  ;;  %s2989_s23 = int_to_ptr.vmem [resolvable:$false] %s2988_s23 }
  0x13   : > { %s2990_s26 = scalar_lea.vmem (!%p192_p10), %s2989_s23, 32768 }
  0x14   : > { %2698 = vmatpush3.bf16.msra.mxu0 (!%p192_p10), %v2913_v1  ;;  %2848 = vmatpush3.bf16.msra.mxu1 (!%p192_p10), %v2913_v1 }
  0x15   : > { %2699 = vmatprep.subr.bf16.mxu0 (!%p192_p10), %v2914_v2  ;;  %2841 = vmatprep.subr.bf16.mxu1 (!%p192_p10), %v2914_v2 }
  0x16   : > { %s3573_s28 = smov (!%p230_p11, %s2542_s28), 1023 }
  0x17   : > { %s2543_s6 = sshll.u32 %s3573_s28, 2 }
  0x18   : > { %s3155_s9 = scalar_lea.vmem %s3559_s0, %s2543_s6  ;;  %2700 = vmatpush3.bf16.msra.mxu0 %v2914_v2  ;;  %2849 = vmatpush3.bf16.msra.mxu1 %v2914_v2  ;;  %s2541_s6 = sshll.u32 %s226_s30, 10 }
  0x19   : > { %v2920_v4 = vld [vmem:[%s3155_s9] sm:$0xff]   ;;  %2701 = vmatprep.subr.bf16.mxu0 %v2915_v3  ;;  %2842 = vmatprep.subr.bf16.mxu1 %v2915_v3  ;;  %v2922_v10 = vld [vmem:[%s3155_s9 + $0x8] sm:$0xff]   ;;  %v2924_v12 = vld [vmem:[%s3155_s9 + $0x10] sm:$0xff]   ;;  %s3252_s7 = scalar_lea.vmem [#allocation3], %s2541_s6 }
  0x1a   : > { %v2921_v5 = vld [vmem:[%s3155_s9 + $0x100] sm:$0xff]   ;;  %2711 = vmatprep.mubr.bf16.mxu0 %v2920_v4  ;;  %v2923_v11 = vld [vmem:[%s3155_s9 + $0x108] sm:$0xff]   ;;  %v2925_v13 = vld [vmem:[%s3155_s9 + $0x110] sm:$0xff]  }
  0x1b   : > { %2775 = vmatprep.mubr.bf16.mxu1 %v2921_v5  ;;  %v2926_v14 = vld [vmem:[%s3155_s9 + $0x18] sm:$0xff]   ;;  %v2928_v16 = vld [vmem:[%s3155_s9 + $0x20] sm:$0xff]   ;;  %v2930_v18 = vld [vmem:[%s3155_s9 + $0x28] sm:$0xff]  }
  0x1c   : > { %2702 = vmatpush3.bf16.msra.mxu0 %v2915_v3  ;;  %2850 = vmatpush3.bf16.msra.mxu1 %v2915_v3  ;;  %v2927_v15 = vld [vmem:[%s3155_s9 + $0x118] sm:$0xff]   ;;  %v2929_v17 = vld [vmem:[%s3155_s9 + $0x120] sm:$0xff]   ;;  %v2931_v19 = vld [vmem:[%s3155_s9 + $0x128] sm:$0xff]  }
  0x1d   : > { %2703 = vmatprep.subr.bf16.mxu0 %v2916_v6  ;;  %2843 = vmatprep.subr.bf16.mxu1 %v2916_v6  ;;  %v2932_v20 = vld [vmem:[%s3155_s9 + $0x30] sm:$0xff]   ;;  %v2934_v22 = vld [vmem:[%s3155_s9 + $0x38] sm:$0xff]   ;;  %v2936_v24 = vld [vmem:[%s3155_s9 + $0x40] sm:$0xff]  }
  0x1e   : > { %v2933_v21 = vld [vmem:[%s3155_s9 + $0x130] sm:$0xff]   ;;  %v2935_v23 = vld [vmem:[%s3155_s9 + $0x138] sm:$0xff]   ;;  %v2937_v25 = vld [vmem:[%s3155_s9 + $0x140] sm:$0xff]  }
  0x1f   : > { %v2938_v26 = vld [vmem:[%s3155_s9 + $0x48] sm:$0xff]   ;;  %v2940_v28 = vld [vmem:[%s3155_s9 + $0x50] sm:$0xff]   ;;  %v2942_v30 = vld [vmem:[%s3155_s9 + $0x58] sm:$0xff]  }
  0x20   : > { %2704 = vmatpush3.bf16.msra.mxu0 %v2916_v6  ;;  %2851 = vmatpush3.bf16.msra.mxu1 %v2916_v6  ;;  %v2939_v27 = vld [vmem:[%s3155_s9 + $0x148] sm:$0xff]   ;;  %v2941_v29 = vld [vmem:[%s3155_s9 + $0x150] sm:$0xff]   ;;  %v2943_v31 = vld [vmem:[%s3155_s9 + $0x158] sm:$0xff]  }
  0x21   : > { %2705 = vmatprep.subr.bf16.mxu0 %v2917_v7  ;;  %2844 = vmatprep.subr.bf16.mxu1 %v2917_v7  ;;  %v2944_v32 = vld [vmem:[%s3155_s9 + $0x60] sm:$0xff]   ;;  %v2946_v34 = vld [vmem:[%s3155_s9 + $0x68] sm:$0xff]   ;;  %v2948_v36 = vld [vmem:[%s3155_s9 + $0x70] sm:$0xff]  }
  0x22   : > { %v2945_v33 = vld [vmem:[%s3155_s9 + $0x160] sm:$0xff]   ;;  %v2947_v35 = vld [vmem:[%s3155_s9 + $0x168] sm:$0xff]   ;;  %v2949_v37 = vld [vmem:[%s3155_s9 + $0x170] sm:$0xff]  }
  0x23   : > { %v2950_v38 = vld [vmem:[%s3155_s9 + $0x78] sm:$0xff]   ;;  %v2952_v40 = vld [vmem:[%s3155_s9 + $0x80] sm:$0xff]   ;;  %v2954_v42 = vld [vmem:[%s3155_s9 + $0x88] sm:$0xff]  }
  0x24   : > { %2706 = vmatpush3.bf16.msra.mxu0 %v2917_v7  ;;  %2852 = vmatpush3.bf16.msra.mxu1 %v2917_v7  ;;  %v2951_v39 = vld [vmem:[%s3155_s9 + $0x178] sm:$0xff]   ;;  %v2953_v41 = vld [vmem:[%s3155_s9 + $0x180] sm:$0xff]   ;;  %v2955_v43 = vld [vmem:[%s3155_s9 + $0x188] sm:$0xff]  }
  0x25   : > { %2707 = vmatprep.subr.bf16.mxu0 %v2918_v8  ;;  %2845 = vmatprep.subr.bf16.mxu1 %v2918_v8  ;;  %v2956_v44 = vld [vmem:[%s3155_s9 + $0x90] sm:$0xff]   ;;  %v2958_v46 = vld [vmem:[%s3155_s9 + $0x98] sm:$0xff]   ;;  %v2960_v48 = vld [vmem:[%s3155_s9 + $0xa0] sm:$0xff]  }
  0x26   : > { %v2957_v45 = vld [vmem:[%s3155_s9 + $0x190] sm:$0xff]   ;;  %v2959_v47 = vld [vmem:[%s3155_s9 + $0x198] sm:$0xff]   ;;  %v2961_v49 = vld [vmem:[%s3155_s9 + $0x1a0] sm:$0xff]  }
  0x27   : > { %v2962_v50 = vld [vmem:[%s3155_s9 + $0xa8] sm:$0xff]   ;;  %v2964_v52 = vld [vmem:[%s3155_s9 + $0xb0] sm:$0xff]   ;;  %v2966_v54 = vld [vmem:[%s3155_s9 + $0xb8] sm:$0xff]  }
  0x28   : > { %2708 = vmatpush3.bf16.msra.mxu0 %v2918_v8  ;;  %2853 = vmatpush3.bf16.msra.mxu1 %v2918_v8  ;;  %v2963_v51 = vld [vmem:[%s3155_s9 + $0x1a8] sm:$0xff]   ;;  %v2965_v53 = vld [vmem:[%s3155_s9 + $0x1b0] sm:$0xff]   ;;  %v2967_v55 = vld [vmem:[%s3155_s9 + $0x1b8] sm:$0xff]  }
  0x29   : > { %2709 = vmatprep.subr.bf16.mxu0 %v2919_v9  ;;  %2846 = vmatprep.subr.bf16.mxu1 %v2919_v9  ;;  %v2968_v56 = vld [vmem:[%s3155_s9 + $0xc0] sm:$0xff]   ;;  %v2970_v58 = vld [vmem:[%s3155_s9 + $0xc8] sm:$0xff]   ;;  %v2972_v60 = vld [vmem:[%s3155_s9 + $0xd0] sm:$0xff]  }
  0x2a   : > { %v2969_v57 = vld [vmem:[%s3155_s9 + $0x1c0] sm:$0xff]   ;;  %v2971_v59 = vld [vmem:[%s3155_s9 + $0x1c8] sm:$0xff]   ;;  %v2973_v61 = vld [vmem:[%s3155_s9 + $0x1d0] sm:$0xff]  }
  0x2b   : > { %v2974_v62 = vld [vmem:[%s3155_s9 + $0xd8] sm:$0xff]   ;;  %v2976_v0 = vld [vmem:[%s3155_s9 + $0xe0] sm:$0xff]   ;;  %v2978_v2 = vld [vmem:[%s3155_s9 + $0xe8] sm:$0xff]  }
  0x2c   : > { %2710 = vmatpush3.bf16.msra.mxu0 %v2919_v9  ;;  %2854 = vmatpush3.bf16.msra.mxu1 %v2919_v9  ;;  %v2975_v63 = vld [vmem:[%s3155_s9 + $0x1d8] sm:$0xff]   ;;  %v2977_v1 = vld [vmem:[%s3155_s9 + $0x1e0] sm:$0xff]   ;;  %v2979_v3 = vld [vmem:[%s3155_s9 + $0x1e8] sm:$0xff]  }
  0x2d   : > { %v2980_v4 = vld [vmem:[%s3155_s9 + $0xf0] sm:$0xff]   ;;  %v2982_v6 = vld [vmem:[%s3155_s9 + $0xf8] sm:$0xff]   ;;  %v3240_v8 = vld [vmem:[%s3561_s2] ss:$0 sm:$0xff] }
  0x2e   : > { %v2981_v5 = vld [vmem:[%s3155_s9 + $0x1f0] sm:$0xff]   ;;  %v2983_v7 = vld [vmem:[%s3155_s9 + $0x1f8] sm:$0xff]   ;;  %s2426_s9 = sshll.u32 %s3252_s7, 4  ;;  %s3503_s9 = int_to_ptr.vmem [resolvable:$true] %s2426_s9 }
  0x2f   : > { %2712 = vmatmul.mubr.bf16.vlgmr.msra.gmra.mrb[0].mxu0 %v2922_v10  ;;  %2776 = vmatmul.mubr.bf16.vlgmr.msra.gmra.mrb[0].mxu1 %v2923_v11  ;;  %s2984_s19 = scalar_lea.vmem %s3503_s9, 16384  ;;  %p2991_p1 = scmp.lt.s32.totalorder %s3503_s9, %s2989_s23 }
  0x30   : > { %2715 = vmatprep.mubr.bf16.mxu0 %v2924_v12  ;;  %2779 = vmatprep.mubr.bf16.mxu1 %v2925_v13  ;;  %p2985_p12 = scmp.ne.s32.totalorder %s3503_s9, %s2984_s19  ;;  %p2992_p2 = scmp.lt.s32.totalorder %s2990_s26, %s2984_s19 }
  0x32   : > { %p2986_p13 = pnand %p2985_p12, %p3127_p4  ;;  %p2993_p3 = por %p2992_p2, %p2991_p1 }
  0x34   : > { %p2987_p0 = pneg %p2986_p13 }
  0x36   : > { %p2994_p5 = pnand %p2993_p3, %p2987_p0 }
  0x37   : > { %2716 = vmatmul.mubr.bf16.gmra.mrb[4].mxu0 %v2926_v14  ;;  %2780 = vmatmul.mubr.bf16.gmra.mrb[4].mxu1 %v2927_v15 }
  0x38   : > { %2719 = vmatprep.mubr.bf16.mxu0 %v2928_v16  ;;  %2783 = vmatprep.mubr.bf16.mxu1 %v2929_v17 }
  0x3f   : > { %2720 = vmatmul.mubr.bf16.gmra.mrb[8].mxu0 %v2930_v18  ;;  %2784 = vmatmul.mubr.bf16.gmra.mrb[8].mxu1 %v2931_v19 }
  0x40   : > { %2723 = vmatprep.mubr.bf16.mxu0 %v2932_v20  ;;  %2787 = vmatprep.mubr.bf16.mxu1 %v2933_v21 }
  0x47   : > { %2724 = vmatmul.mubr.bf16.gmra.mrb[12].mxu0 %v2934_v22  ;;  %2788 = vmatmul.mubr.bf16.gmra.mrb[12].mxu1 %v2935_v23 }
  0x48   : > { %2727 = vmatprep.mubr.bf16.mxu0 %v2936_v24  ;;  %2791 = vmatprep.mubr.bf16.mxu1 %v2937_v25 }
  0x4f   : > { %2728 = vmatmul.mubr.bf16.gmra.mrb[16].mxu0 %v2938_v26  ;;  %2792 = vmatmul.mubr.bf16.gmra.mrb[16].mxu1 %v2939_v27 }
  0x50   : > { %2731 = vmatprep.mubr.bf16.mxu0 %v2940_v28  ;;  %2795 = vmatprep.mubr.bf16.mxu1 %v2941_v29 }
  0x57   : > { %2732 = vmatmul.mubr.bf16.gmra.mrb[20].mxu0 %v2942_v30  ;;  %2796 = vmatmul.mubr.bf16.gmra.mrb[20].mxu1 %v2943_v31 }
  0x58   : > { %2735 = vmatprep.mubr.bf16.mxu0 %v2944_v32  ;;  %2799 = vmatprep.mubr.bf16.mxu1 %v2945_v33 }
  0x5f   : > { %2736 = vmatmul.mubr.bf16.gmra.mrb[24].mxu0 %v2946_v34  ;;  %2800 = vmatmul.mubr.bf16.gmra.mrb[24].mxu1 %v2947_v35 }
  0x60   : > { %2739 = vmatprep.mubr.bf16.mxu0 %v2948_v36  ;;  %2803 = vmatprep.mubr.bf16.mxu1 %v2949_v37 }
  0x67   : > { %2740 = vmatmul.mubr.bf16.gmra.mrb[28].mxu0 %v2950_v38  ;;  %2804 = vmatmul.mubr.bf16.gmra.mrb[28].mxu1 %v2951_v39 }
  0x68   : > { %2743 = vmatprep.mubr.bf16.mxu0 %v2952_v40  ;;  %2807 = vmatprep.mubr.bf16.mxu1 %v2953_v41 }
  0x6f   : > { %2744 = vmatmul.mubr.bf16.gmra.mrb[32].mxu0 %v2954_v42  ;;  %2808 = vmatmul.mubr.bf16.gmra.mrb[32].mxu1 %v2955_v43 }
  0x70   : > { %2747 = vmatprep.mubr.bf16.mxu0 %v2956_v44  ;;  %2811 = vmatprep.mubr.bf16.mxu1 %v2957_v45 }
  0x77   : > { %2748 = vmatmul.mubr.bf16.gmra.mrb[36].mxu0 %v2958_v46  ;;  %2812 = vmatmul.mubr.bf16.gmra.mrb[36].mxu1 %v2959_v47 }
  0x78   : > { %2751 = vmatprep.mubr.bf16.mxu0 %v2960_v48  ;;  %2815 = vmatprep.mubr.bf16.mxu1 %v2961_v49 }
  0x7f   : > { %2752 = vmatmul.mubr.bf16.gmra.mrb[40].mxu0 %v2962_v50  ;;  %2816 = vmatmul.mubr.bf16.gmra.mrb[40].mxu1 %v2963_v51 }
  0x80   : > { %2755 = vmatprep.mubr.bf16.mxu0 %v2964_v52  ;;  %2819 = vmatprep.mubr.bf16.mxu1 %v2965_v53 }
  0x87   : > { %2756 = vmatmul.mubr.bf16.gmra.mrb[44].mxu0 %v2966_v54  ;;  %2820 = vmatmul.mubr.bf16.gmra.mrb[44].mxu1 %v2967_v55 }
  0x88   : > { %2759 = vmatprep.mubr.bf16.mxu0 %v2968_v56  ;;  %2823 = vmatprep.mubr.bf16.mxu1 %v2969_v57 }
  0x8f   : > { %2760 = vmatmul.mubr.bf16.gmra.mrb[48].mxu0 %v2970_v58  ;;  %2824 = vmatmul.mubr.bf16.gmra.mrb[48].mxu1 %v2971_v59 }
  0x90   : > { %2763 = vmatprep.mubr.bf16.mxu0 %v2972_v60  ;;  %2827 = vmatprep.mubr.bf16.mxu1 %v2973_v61 }
  0x97   : > { %2764 = vmatmul.mubr.bf16.gmra.mrb[52].mxu0 %v2974_v62  ;;  %2828 = vmatmul.mubr.bf16.gmra.mrb[52].mxu1 %v2975_v63 }
  0x98   : > { %2767 = vmatprep.mubr.bf16.mxu0 %v2976_v0  ;;  %2831 = vmatprep.mubr.bf16.mxu1 %v2977_v1 }
  0x9f   : > { %2768 = vmatmul.mubr.bf16.gmra.mrb[56].mxu0 %v2978_v2  ;;  %2832 = vmatmul.mubr.bf16.gmra.mrb[56].mxu1 %v2979_v3 }
  0xa0   : > { %2771 = vmatprep.mubr.bf16.mxu0 %v2980_v4  ;;  %2835 = vmatprep.mubr.bf16.mxu1 %v2981_v5 }
  0xa7   : > { %2772 = vmatmul.mubr.bf16.gmra.mrb[60].mxu0 %v2982_v6  ;;  %2836 = vmatmul.mubr.bf16.gmra.mrb[60].mxu1 %v2983_v7 }
 0x102   : > { %v2713_v9 = vpop.f32.mrb[0].mxu0  ;;  %v2777_v10 = vpop.f32.mrb[0].mxu1 }
 0x103   : > { %v2029_v11 = vadd.f32 %v2713_v9, %v3240_v8  ;;  %v2093_v12 = vadd.f32 %v2777_v10, %v3240_v8  ;;  %v1122_v13 = vpop.f32.mrb[1].mxu0  ;;  %v1378_v14 = vpop.f32.mrb[1].mxu1 }
 0x104   : > { %v2027_v15 = vadd.f32 %v3240_v8, %v1122_v13  ;;  %v2091_v16 = vadd.f32 %v3240_v8, %v1378_v14  ;;  %v2714_v17 = vpop.f32.mrb[2].mxu0  ;;  %v2778_v18 = vpop.f32.mrb[2].mxu1 }
 0x105   : > { %v2157_v19 = vmax.f32 %v2029_v11, 0.0  ;;  %v2221_v20 = vmax.f32 %v2093_v12, 0.0  ;;  %v2030_v21 = vadd.f32 %v2714_v17, %v3240_v8  ;;  %v2094_v22 = vadd.f32 %v2778_v18, %v3240_v8  ;;  %v1125_v23 = vpop.f32.mrb[3].mxu0  ;;  %v1381_v24 = vpop.f32.mrb[3].mxu1 }
 0x106   : > { %v2155_v25 = vmax.f32 %v2027_v15, 0.0  ;;  %v2219_v26 = vmax.f32 %v2091_v16, 0.0  ;;  %v2028_v27 = vadd.f32 %v3240_v8, %v1125_v23  ;;  %v2092_v28 = vadd.f32 %v3240_v8, %v1381_v24 }
 0x107   : > { %2285 = vst [vmem:[%s3252_s7 + $0x10] sm:$0xff] %v2157_v19  ;;  %2349 = vst [vmem:[%s3252_s7 + $0x210] sm:$0xff] %v2221_v20  ;;  %v2158_v29 = vmax.f32 %v2030_v21, 0.0  ;;  %v2222_v30 = vmax.f32 %v2094_v22, 0.0 }
 0x108   : > { %2283 = vst [vmem:[%s3252_s7] sm:$0xff] %v2155_v25  ;;  %2347 = vst [vmem:[%s3252_s7 + $0x200] sm:$0xff] %v2219_v26  ;;  %v2156_v31 = vmax.f32 %v2028_v27, 0.0  ;;  %v2220_v32 = vmax.f32 %v2092_v28, 0.0 }
 0x109   : > { %2286 = vst [vmem:[%s3252_s7 + $0x18] sm:$0xff] %v2158_v29  ;;  %2350 = vst [vmem:[%s3252_s7 + $0x218] sm:$0xff] %v2222_v30 }
 0x10a   : > { %2284 = vst [vmem:[%s3252_s7 + $0x8] sm:$0xff] %v2156_v31  ;;  %2348 = vst [vmem:[%s3252_s7 + $0x208] sm:$0xff] %v2220_v32  ;;  %v2717_v33 = vpop.f32.mrb[4].mxu0  ;;  %v2781_v34 = vpop.f32.mrb[4].mxu1 }
 0x10b   : > { %v2033_v35 = vadd.f32 %v2717_v33, %v3240_v8  ;;  %v2097_v36 = vadd.f32 %v2781_v34, %v3240_v8  ;;  %v1138_v37 = vpop.f32.mrb[5].mxu0  ;;  %v1394_v38 = vpop.f32.mrb[5].mxu1 }
 0x10c   : > { %v2031_v39 = vadd.f32 %v3240_v8, %v1138_v37  ;;  %v2095_v40 = vadd.f32 %v3240_v8, %v1394_v38  ;;  %v2718_v41 = vpop.f32.mrb[6].mxu0  ;;  %v2782_v42 = vpop.f32.mrb[6].mxu1 }
 0x10d   : > { %v2161_v43 = vmax.f32 %v2033_v35, 0.0  ;;  %v2225_v44 = vmax.f32 %v2097_v36, 0.0  ;;  %v2034_v45 = vadd.f32 %v2718_v41, %v3240_v8  ;;  %v2098_v46 = vadd.f32 %v2782_v42, %v3240_v8  ;;  %v1141_v47 = vpop.f32.mrb[7].mxu0  ;;  %v1397_v48 = vpop.f32.mrb[7].mxu1 }
 0x10e   : > { %v2159_v49 = vmax.f32 %v2031_v39, 0.0  ;;  %v2223_v50 = vmax.f32 %v2095_v40, 0.0  ;;  %v2032_v51 = vadd.f32 %v3240_v8, %v1141_v47  ;;  %v2096_v52 = vadd.f32 %v3240_v8, %v1397_v48 }
 0x10f   : > { %2289 = vst [vmem:[%s3252_s7 + $0x30] sm:$0xff] %v2161_v43  ;;  %2353 = vst [vmem:[%s3252_s7 + $0x230] sm:$0xff] %v2225_v44  ;;  %v2162_v53 = vmax.f32 %v2034_v45, 0.0  ;;  %v2226_v54 = vmax.f32 %v2098_v46, 0.0 }
 0x110   : > { %2287 = vst [vmem:[%s3252_s7 + $0x20] sm:$0xff] %v2159_v49  ;;  %2351 = vst [vmem:[%s3252_s7 + $0x220] sm:$0xff] %v2223_v50  ;;  %v2160_v55 = vmax.f32 %v2032_v51, 0.0  ;;  %v2224_v56 = vmax.f32 %v2096_v52, 0.0 }
 0x111   : > { %2290 = vst [vmem:[%s3252_s7 + $0x38] sm:$0xff] %v2162_v53  ;;  %2354 = vst [vmem:[%s3252_s7 + $0x238] sm:$0xff] %v2226_v54 }
 0x112   : > { %2288 = vst [vmem:[%s3252_s7 + $0x28] sm:$0xff] %v2160_v55  ;;  %2352 = vst [vmem:[%s3252_s7 + $0x228] sm:$0xff] %v2224_v56  ;;  %v2721_v57 = vpop.f32.mrb[8].mxu0  ;;  %v2785_v58 = vpop.f32.mrb[8].mxu1 }
 0x113   : > { %v2037_v59 = vadd.f32 %v2721_v57, %v3240_v8  ;;  %v2101_v60 = vadd.f32 %v2785_v58, %v3240_v8  ;;  %v1154_v61 = vpop.f32.mrb[9].mxu0  ;;  %v1410_v62 = vpop.f32.mrb[9].mxu1 }
 0x114   : > { %v2035_v63 = vadd.f32 %v3240_v8, %v1154_v61  ;;  %v2099_v0 = vadd.f32 %v3240_v8, %v1410_v62  ;;  %v2722_v1 = vpop.f32.mrb[10].mxu0  ;;  %v2786_v2 = vpop.f32.mrb[10].mxu1 }
 0x115   : > { %v2165_v3 = vmax.f32 %v2037_v59, 0.0  ;;  %v2229_v4 = vmax.f32 %v2101_v60, 0.0  ;;  %v2038_v5 = vadd.f32 %v2722_v1, %v3240_v8  ;;  %v2102_v6 = vadd.f32 %v2786_v2, %v3240_v8  ;;  %v1157_v7 = vpop.f32.mrb[11].mxu0  ;;  %v1413_v9 = vpop.f32.mrb[11].mxu1 }
 0x116   : > { %v2163_v10 = vmax.f32 %v2035_v63, 0.0  ;;  %v2227_v11 = vmax.f32 %v2099_v0, 0.0  ;;  %v2036_v12 = vadd.f32 %v3240_v8, %v1157_v7  ;;  %v2100_v13 = vadd.f32 %v3240_v8, %v1413_v9 }
 0x117   : > { %2293 = vst [vmem:[%s3252_s7 + $0x50] sm:$0xff] %v2165_v3  ;;  %2357 = vst [vmem:[%s3252_s7 + $0x250] sm:$0xff] %v2229_v4  ;;  %v2166_v14 = vmax.f32 %v2038_v5, 0.0  ;;  %v2230_v15 = vmax.f32 %v2102_v6, 0.0 }
 0x118   : > { %2291 = vst [vmem:[%s3252_s7 + $0x40] sm:$0xff] %v2163_v10  ;;  %2355 = vst [vmem:[%s3252_s7 + $0x240] sm:$0xff] %v2227_v11  ;;  %v2164_v16 = vmax.f32 %v2036_v12, 0.0  ;;  %v2228_v17 = vmax.f32 %v2100_v13, 0.0 }
 0x119   : > { %2294 = vst [vmem:[%s3252_s7 + $0x58] sm:$0xff] %v2166_v14  ;;  %2358 = vst [vmem:[%s3252_s7 + $0x258] sm:$0xff] %v2230_v15 }
 0x11a   : > { %2292 = vst [vmem:[%s3252_s7 + $0x48] sm:$0xff] %v2164_v16  ;;  %2356 = vst [vmem:[%s3252_s7 + $0x248] sm:$0xff] %v2228_v17  ;;  %v2725_v18 = vpop.f32.mrb[12].mxu0  ;;  %v2789_v19 = vpop.f32.mrb[12].mxu1 }
 0x11b   : > { %v2041_v20 = vadd.f32 %v2725_v18, %v3240_v8  ;;  %v2105_v21 = vadd.f32 %v2789_v19, %v3240_v8  ;;  %v1170_v22 = vpop.f32.mrb[13].mxu0  ;;  %v1426_v23 = vpop.f32.mrb[13].mxu1 }
 0x11c   : > { %v2039_v24 = vadd.f32 %v3240_v8, %v1170_v22  ;;  %v2103_v25 = vadd.f32 %v3240_v8, %v1426_v23  ;;  %v2726_v26 = vpop.f32.mrb[14].mxu0  ;;  %v2790_v27 = vpop.f32.mrb[14].mxu1 }
 0x11d   : > { %v2169_v28 = vmax.f32 %v2041_v20, 0.0  ;;  %v2233_v29 = vmax.f32 %v2105_v21, 0.0  ;;  %v2042_v30 = vadd.f32 %v2726_v26, %v3240_v8  ;;  %v2106_v31 = vadd.f32 %v2790_v27, %v3240_v8  ;;  %v1173_v32 = vpop.f32.mrb[15].mxu0  ;;  %v1429_v33 = vpop.f32.mrb[15].mxu1 }
 0x11e   : > { %v2167_v34 = vmax.f32 %v2039_v24, 0.0  ;;  %v2231_v35 = vmax.f32 %v2103_v25, 0.0  ;;  %v2040_v36 = vadd.f32 %v3240_v8, %v1173_v32  ;;  %v2104_v37 = vadd.f32 %v3240_v8, %v1429_v33 }
 0x11f   : > { %2297 = vst [vmem:[%s3252_s7 + $0x70] sm:$0xff] %v2169_v28  ;;  %2361 = vst [vmem:[%s3252_s7 + $0x270] sm:$0xff] %v2233_v29  ;;  %v2170_v38 = vmax.f32 %v2042_v30, 0.0  ;;  %v2234_v39 = vmax.f32 %v2106_v31, 0.0 }
 0x120   : > { %2295 = vst [vmem:[%s3252_s7 + $0x60] sm:$0xff] %v2167_v34  ;;  %2359 = vst [vmem:[%s3252_s7 + $0x260] sm:$0xff] %v2231_v35  ;;  %v2168_v40 = vmax.f32 %v2040_v36, 0.0  ;;  %v2232_v41 = vmax.f32 %v2104_v37, 0.0 }
 0x121   : > { %2298 = vst [vmem:[%s3252_s7 + $0x78] sm:$0xff] %v2170_v38  ;;  %2362 = vst [vmem:[%s3252_s7 + $0x278] sm:$0xff] %v2234_v39 }
 0x122   : > { %2296 = vst [vmem:[%s3252_s7 + $0x68] sm:$0xff] %v2168_v40  ;;  %2360 = vst [vmem:[%s3252_s7 + $0x268] sm:$0xff] %v2232_v41  ;;  %v2729_v42 = vpop.f32.mrb[16].mxu0  ;;  %v2793_v43 = vpop.f32.mrb[16].mxu1 }
 0x123   : > { %v2045_v44 = vadd.f32 %v2729_v42, %v3240_v8  ;;  %v2109_v45 = vadd.f32 %v2793_v43, %v3240_v8  ;;  %v1186_v46 = vpop.f32.mrb[17].mxu0  ;;  %v1442_v47 = vpop.f32.mrb[17].mxu1 }
 0x124   : > { %v2043_v48 = vadd.f32 %v3240_v8, %v1186_v46  ;;  %v2107_v49 = vadd.f32 %v3240_v8, %v1442_v47  ;;  %v2730_v50 = vpop.f32.mrb[18].mxu0  ;;  %v2794_v51 = vpop.f32.mrb[18].mxu1 }
 0x125   : > { %v2173_v52 = vmax.f32 %v2045_v44, 0.0  ;;  %v2237_v53 = vmax.f32 %v2109_v45, 0.0  ;;  %v2046_v54 = vadd.f32 %v2730_v50, %v3240_v8  ;;  %v2110_v55 = vadd.f32 %v2794_v51, %v3240_v8  ;;  %v1189_v56 = vpop.f32.mrb[19].mxu0  ;;  %v1445_v57 = vpop.f32.mrb[19].mxu1 }
 0x126   : > { %v2171_v58 = vmax.f32 %v2043_v48, 0.0  ;;  %v2235_v59 = vmax.f32 %v2107_v49, 0.0  ;;  %v2044_v60 = vadd.f32 %v3240_v8, %v1189_v56  ;;  %v2108_v61 = vadd.f32 %v3240_v8, %v1445_v57 }
 0x127   : > { %2301 = vst [vmem:[%s3252_s7 + $0x90] sm:$0xff] %v2173_v52  ;;  %2365 = vst [vmem:[%s3252_s7 + $0x290] sm:$0xff] %v2237_v53  ;;  %v2174_v62 = vmax.f32 %v2046_v54, 0.0  ;;  %v2238_v63 = vmax.f32 %v2110_v55, 0.0 }
 0x128   : > { %2299 = vst [vmem:[%s3252_s7 + $0x80] sm:$0xff] %v2171_v58  ;;  %2363 = vst [vmem:[%s3252_s7 + $0x280] sm:$0xff] %v2235_v59  ;;  %v2172_v0 = vmax.f32 %v2044_v60, 0.0  ;;  %v2236_v1 = vmax.f32 %v2108_v61, 0.0 }
 0x129   : > { %2302 = vst [vmem:[%s3252_s7 + $0x98] sm:$0xff] %v2174_v62  ;;  %2366 = vst [vmem:[%s3252_s7 + $0x298] sm:$0xff] %v2238_v63 }
 0x12a   : > { %2300 = vst [vmem:[%s3252_s7 + $0x88] sm:$0xff] %v2172_v0  ;;  %2364 = vst [vmem:[%s3252_s7 + $0x288] sm:$0xff] %v2236_v1  ;;  %v2733_v2 = vpop.f32.mrb[20].mxu0  ;;  %v2797_v3 = vpop.f32.mrb[20].mxu1 }
 0x12b   : > { %v2049_v4 = vadd.f32 %v2733_v2, %v3240_v8  ;;  %v2113_v5 = vadd.f32 %v2797_v3, %v3240_v8  ;;  %v1202_v6 = vpop.f32.mrb[21].mxu0  ;;  %v1458_v7 = vpop.f32.mrb[21].mxu1 }
 0x12c   : > { %v2047_v9 = vadd.f32 %v3240_v8, %v1202_v6  ;;  %v2111_v10 = vadd.f32 %v3240_v8, %v1458_v7  ;;  %v2734_v11 = vpop.f32.mrb[22].mxu0  ;;  %v2798_v12 = vpop.f32.mrb[22].mxu1 }
 0x12d   : > { %v2177_v13 = vmax.f32 %v2049_v4, 0.0  ;;  %v2241_v14 = vmax.f32 %v2113_v5, 0.0  ;;  %v2050_v15 = vadd.f32 %v2734_v11, %v3240_v8  ;;  %v2114_v16 = vadd.f32 %v2798_v12, %v3240_v8  ;;  %v1205_v17 = vpop.f32.mrb[23].mxu0  ;;  %v1461_v18 = vpop.f32.mrb[23].mxu1 }
 0x12e   : > { %v2175_v19 = vmax.f32 %v2047_v9, 0.0  ;;  %v2239_v20 = vmax.f32 %v2111_v10, 0.0  ;;  %v2048_v21 = vadd.f32 %v3240_v8, %v1205_v17  ;;  %v2112_v22 = vadd.f32 %v3240_v8, %v1461_v18 }
 0x12f   : > { %2305 = vst [vmem:[%s3252_s7 + $0xb0] sm:$0xff] %v2177_v13  ;;  %2369 = vst [vmem:[%s3252_s7 + $0x2b0] sm:$0xff] %v2241_v14  ;;  %v2178_v23 = vmax.f32 %v2050_v15, 0.0  ;;  %v2242_v24 = vmax.f32 %v2114_v16, 0.0 }
 0x130   : > { %2303 = vst [vmem:[%s3252_s7 + $0xa0] sm:$0xff] %v2175_v19  ;;  %2367 = vst [vmem:[%s3252_s7 + $0x2a0] sm:$0xff] %v2239_v20  ;;  %v2176_v25 = vmax.f32 %v2048_v21, 0.0  ;;  %v2240_v26 = vmax.f32 %v2112_v22, 0.0 }
 0x131   : > { %2306 = vst [vmem:[%s3252_s7 + $0xb8] sm:$0xff] %v2178_v23  ;;  %2370 = vst [vmem:[%s3252_s7 + $0x2b8] sm:$0xff] %v2242_v24 }
 0x132   : > { %2304 = vst [vmem:[%s3252_s7 + $0xa8] sm:$0xff] %v2176_v25  ;;  %2368 = vst [vmem:[%s3252_s7 + $0x2a8] sm:$0xff] %v2240_v26  ;;  %v2737_v27 = vpop.f32.mrb[24].mxu0  ;;  %v2801_v28 = vpop.f32.mrb[24].mxu1 }
 0x133   : > { %v2053_v29 = vadd.f32 %v2737_v27, %v3240_v8  ;;  %v2117_v30 = vadd.f32 %v2801_v28, %v3240_v8  ;;  %v1218_v31 = vpop.f32.mrb[25].mxu0  ;;  %v1474_v32 = vpop.f32.mrb[25].mxu1 }
 0x134   : > { %v2051_v33 = vadd.f32 %v3240_v8, %v1218_v31  ;;  %v2115_v34 = vadd.f32 %v3240_v8, %v1474_v32  ;;  %v2738_v35 = vpop.f32.mrb[26].mxu0  ;;  %v2802_v36 = vpop.f32.mrb[26].mxu1 }
 0x135   : > { %v2181_v37 = vmax.f32 %v2053_v29, 0.0  ;;  %v2245_v38 = vmax.f32 %v2117_v30, 0.0  ;;  %v2054_v39 = vadd.f32 %v2738_v35, %v3240_v8  ;;  %v2118_v40 = vadd.f32 %v2802_v36, %v3240_v8  ;;  %v1221_v41 = vpop.f32.mrb[27].mxu0  ;;  %v1477_v42 = vpop.f32.mrb[27].mxu1 }
 0x136   : > { %v2179_v43 = vmax.f32 %v2051_v33, 0.0  ;;  %v2243_v44 = vmax.f32 %v2115_v34, 0.0  ;;  %v2052_v45 = vadd.f32 %v3240_v8, %v1221_v41  ;;  %v2116_v46 = vadd.f32 %v3240_v8, %v1477_v42 }
 0x137   : > { %2309 = vst [vmem:[%s3252_s7 + $0xd0] sm:$0xff] %v2181_v37  ;;  %2373 = vst [vmem:[%s3252_s7 + $0x2d0] sm:$0xff] %v2245_v38  ;;  %v2182_v47 = vmax.f32 %v2054_v39, 0.0  ;;  %v2246_v48 = vmax.f32 %v2118_v40, 0.0 }
 0x138   : > { %2307 = vst [vmem:[%s3252_s7 + $0xc0] sm:$0xff] %v2179_v43  ;;  %2371 = vst [vmem:[%s3252_s7 + $0x2c0] sm:$0xff] %v2243_v44  ;;  %v2180_v49 = vmax.f32 %v2052_v45, 0.0  ;;  %v2244_v50 = vmax.f32 %v2116_v46, 0.0 }
 0x139   : > { %2310 = vst [vmem:[%s3252_s7 + $0xd8] sm:$0xff] %v2182_v47  ;;  %2374 = vst [vmem:[%s3252_s7 + $0x2d8] sm:$0xff] %v2246_v48 }
 0x13a   : > { %2308 = vst [vmem:[%s3252_s7 + $0xc8] sm:$0xff] %v2180_v49  ;;  %2372 = vst [vmem:[%s3252_s7 + $0x2c8] sm:$0xff] %v2244_v50  ;;  %v2741_v51 = vpop.f32.mrb[28].mxu0  ;;  %v2805_v52 = vpop.f32.mrb[28].mxu1 }
 0x13b   : > { %v2057_v53 = vadd.f32 %v2741_v51, %v3240_v8  ;;  %v2121_v54 = vadd.f32 %v2805_v52, %v3240_v8  ;;  %v1234_v55 = vpop.f32.mrb[29].mxu0  ;;  %v1490_v56 = vpop.f32.mrb[29].mxu1 }
 0x13c   : > { %v2055_v57 = vadd.f32 %v3240_v8, %v1234_v55  ;;  %v2119_v58 = vadd.f32 %v3240_v8, %v1490_v56  ;;  %v2742_v59 = vpop.f32.mrb[30].mxu0  ;;  %v2806_v60 = vpop.f32.mrb[30].mxu1 }
 0x13d   : > { %v2185_v61 = vmax.f32 %v2057_v53, 0.0  ;;  %v2249_v62 = vmax.f32 %v2121_v54, 0.0  ;;  %v2058_v63 = vadd.f32 %v2742_v59, %v3240_v8  ;;  %v2122_v0 = vadd.f32 %v2806_v60, %v3240_v8  ;;  %v1237_v1 = vpop.f32.mrb[31].mxu0  ;;  %v1493_v2 = vpop.f32.mrb[31].mxu1 }
 0x13e   : > { %v2183_v3 = vmax.f32 %v2055_v57, 0.0  ;;  %v2247_v4 = vmax.f32 %v2119_v58, 0.0  ;;  %v2056_v5 = vadd.f32 %v3240_v8, %v1237_v1  ;;  %v2120_v6 = vadd.f32 %v3240_v8, %v1493_v2 }
 0x13f   : > { %2313 = vst [vmem:[%s3252_s7 + $0xf0] sm:$0xff] %v2185_v61  ;;  %2377 = vst [vmem:[%s3252_s7 + $0x2f0] sm:$0xff] %v2249_v62  ;;  %v2186_v7 = vmax.f32 %v2058_v63, 0.0  ;;  %v2250_v9 = vmax.f32 %v2122_v0, 0.0 }
 0x140   : > { %2311 = vst [vmem:[%s3252_s7 + $0xe0] sm:$0xff] %v2183_v3  ;;  %2375 = vst [vmem:[%s3252_s7 + $0x2e0] sm:$0xff] %v2247_v4  ;;  %v2184_v10 = vmax.f32 %v2056_v5, 0.0  ;;  %v2248_v11 = vmax.f32 %v2120_v6, 0.0 }
 0x141   : > { %2314 = vst [vmem:[%s3252_s7 + $0xf8] sm:$0xff] %v2186_v7  ;;  %2378 = vst [vmem:[%s3252_s7 + $0x2f8] sm:$0xff] %v2250_v9 }
 0x142   : > { %2312 = vst [vmem:[%s3252_s7 + $0xe8] sm:$0xff] %v2184_v10  ;;  %2376 = vst [vmem:[%s3252_s7 + $0x2e8] sm:$0xff] %v2248_v11  ;;  %v2745_v12 = vpop.f32.mrb[32].mxu0  ;;  %v2809_v13 = vpop.f32.mrb[32].mxu1 }
 0x143   : > { %v2061_v14 = vadd.f32 %v2745_v12, %v3240_v8  ;;  %v2125_v15 = vadd.f32 %v2809_v13, %v3240_v8  ;;  %v1250_v16 = vpop.f32.mrb[33].mxu0  ;;  %v1506_v17 = vpop.f32.mrb[33].mxu1 }
 0x144   : > { %v2059_v18 = vadd.f32 %v3240_v8, %v1250_v16  ;;  %v2123_v19 = vadd.f32 %v3240_v8, %v1506_v17  ;;  %v2746_v20 = vpop.f32.mrb[34].mxu0  ;;  %v2810_v21 = vpop.f32.mrb[34].mxu1 }
 0x145   : > { %v2189_v22 = vmax.f32 %v2061_v14, 0.0  ;;  %v2253_v23 = vmax.f32 %v2125_v15, 0.0  ;;  %v2062_v24 = vadd.f32 %v2746_v20, %v3240_v8  ;;  %v2126_v25 = vadd.f32 %v2810_v21, %v3240_v8  ;;  %v1253_v26 = vpop.f32.mrb[35].mxu0  ;;  %v1509_v27 = vpop.f32.mrb[35].mxu1 }
 0x146   : > { %v2187_v28 = vmax.f32 %v2059_v18, 0.0  ;;  %v2251_v29 = vmax.f32 %v2123_v19, 0.0  ;;  %v2060_v30 = vadd.f32 %v3240_v8, %v1253_v26  ;;  %v2124_v31 = vadd.f32 %v3240_v8, %v1509_v27 }
 0x147   : > { %2317 = vst [vmem:[%s3252_s7 + $0x110] sm:$0xff] %v2189_v22  ;;  %2381 = vst [vmem:[%s3252_s7 + $0x310] sm:$0xff] %v2253_v23  ;;  %v2190_v32 = vmax.f32 %v2062_v24, 0.0  ;;  %v2254_v33 = vmax.f32 %v2126_v25, 0.0 }
 0x148   : > { %2315 = vst [vmem:[%s3252_s7 + $0x100] sm:$0xff] %v2187_v28  ;;  %2379 = vst [vmem:[%s3252_s7 + $0x300] sm:$0xff] %v2251_v29  ;;  %v2188_v34 = vmax.f32 %v2060_v30, 0.0  ;;  %v2252_v35 = vmax.f32 %v2124_v31, 0.0 }
 0x149   : > { %2318 = vst [vmem:[%s3252_s7 + $0x118] sm:$0xff] %v2190_v32  ;;  %2382 = vst [vmem:[%s3252_s7 + $0x318] sm:$0xff] %v2254_v33 }
 0x14a   : > { %2316 = vst [vmem:[%s3252_s7 + $0x108] sm:$0xff] %v2188_v34  ;;  %2380 = vst [vmem:[%s3252_s7 + $0x308] sm:$0xff] %v2252_v35  ;;  %v2749_v36 = vpop.f32.mrb[36].mxu0  ;;  %v2813_v37 = vpop.f32.mrb[36].mxu1 }
 0x14b   : > { %v2065_v38 = vadd.f32 %v2749_v36, %v3240_v8  ;;  %v2129_v39 = vadd.f32 %v2813_v37, %v3240_v8  ;;  %v1266_v40 = vpop.f32.mrb[37].mxu0  ;;  %v1522_v41 = vpop.f32.mrb[37].mxu1 }
 0x14c   : > { %v2063_v42 = vadd.f32 %v3240_v8, %v1266_v40  ;;  %v2127_v43 = vadd.f32 %v3240_v8, %v1522_v41  ;;  %v2750_v44 = vpop.f32.mrb[38].mxu0  ;;  %v2814_v45 = vpop.f32.mrb[38].mxu1 }
 0x14d   : > { %v2193_v46 = vmax.f32 %v2065_v38, 0.0  ;;  %v2257_v47 = vmax.f32 %v2129_v39, 0.0  ;;  %v2066_v48 = vadd.f32 %v2750_v44, %v3240_v8  ;;  %v2130_v49 = vadd.f32 %v2814_v45, %v3240_v8  ;;  %v1269_v50 = vpop.f32.mrb[39].mxu0  ;;  %v1525_v51 = vpop.f32.mrb[39].mxu1 }
 0x14e   : > { %v2191_v52 = vmax.f32 %v2063_v42, 0.0  ;;  %v2255_v53 = vmax.f32 %v2127_v43, 0.0  ;;  %v2064_v54 = vadd.f32 %v3240_v8, %v1269_v50  ;;  %v2128_v55 = vadd.f32 %v3240_v8, %v1525_v51 }
 0x14f   : > { %2321 = vst [vmem:[%s3252_s7 + $0x130] sm:$0xff] %v2193_v46  ;;  %2385 = vst [vmem:[%s3252_s7 + $0x330] sm:$0xff] %v2257_v47  ;;  %v2194_v56 = vmax.f32 %v2066_v48, 0.0  ;;  %v2258_v57 = vmax.f32 %v2130_v49, 0.0 }
 0x150   : > { %2319 = vst [vmem:[%s3252_s7 + $0x120] sm:$0xff] %v2191_v52  ;;  %2383 = vst [vmem:[%s3252_s7 + $0x320] sm:$0xff] %v2255_v53  ;;  %v2192_v58 = vmax.f32 %v2064_v54, 0.0  ;;  %v2256_v59 = vmax.f32 %v2128_v55, 0.0 }
 0x151   : > { %2322 = vst [vmem:[%s3252_s7 + $0x138] sm:$0xff] %v2194_v56  ;;  %2386 = vst [vmem:[%s3252_s7 + $0x338] sm:$0xff] %v2258_v57 }
 0x152   : > { %2320 = vst [vmem:[%s3252_s7 + $0x128] sm:$0xff] %v2192_v58  ;;  %2384 = vst [vmem:[%s3252_s7 + $0x328] sm:$0xff] %v2256_v59  ;;  %v2753_v60 = vpop.f32.mrb[40].mxu0  ;;  %v2817_v61 = vpop.f32.mrb[40].mxu1 }
 0x153   : > { %v2069_v62 = vadd.f32 %v2753_v60, %v3240_v8  ;;  %v2133_v63 = vadd.f32 %v2817_v61, %v3240_v8  ;;  %v1282_v0 = vpop.f32.mrb[41].mxu0  ;;  %v1538_v1 = vpop.f32.mrb[41].mxu1 }
 0x154   : > { %v2067_v2 = vadd.f32 %v3240_v8, %v1282_v0  ;;  %v2131_v3 = vadd.f32 %v3240_v8, %v1538_v1  ;;  %v2754_v4 = vpop.f32.mrb[42].mxu0  ;;  %v2818_v5 = vpop.f32.mrb[42].mxu1 }
 0x155   : > { %v2197_v6 = vmax.f32 %v2069_v62, 0.0  ;;  %v2261_v7 = vmax.f32 %v2133_v63, 0.0  ;;  %v2070_v9 = vadd.f32 %v2754_v4, %v3240_v8  ;;  %v2134_v10 = vadd.f32 %v2818_v5, %v3240_v8  ;;  %v1285_v11 = vpop.f32.mrb[43].mxu0  ;;  %v1541_v12 = vpop.f32.mrb[43].mxu1 }
 0x156   : > { %v2195_v13 = vmax.f32 %v2067_v2, 0.0  ;;  %v2259_v14 = vmax.f32 %v2131_v3, 0.0  ;;  %v2068_v15 = vadd.f32 %v3240_v8, %v1285_v11  ;;  %v2132_v16 = vadd.f32 %v3240_v8, %v1541_v12 }
 0x157   : > { %2325 = vst [vmem:[%s3252_s7 + $0x150] sm:$0xff] %v2197_v6  ;;  %2389 = vst [vmem:[%s3252_s7 + $0x350] sm:$0xff] %v2261_v7  ;;  %v2198_v17 = vmax.f32 %v2070_v9, 0.0  ;;  %v2262_v18 = vmax.f32 %v2134_v10, 0.0 }
 0x158   : > { %2323 = vst [vmem:[%s3252_s7 + $0x140] sm:$0xff] %v2195_v13  ;;  %2387 = vst [vmem:[%s3252_s7 + $0x340] sm:$0xff] %v2259_v14  ;;  %v2196_v19 = vmax.f32 %v2068_v15, 0.0  ;;  %v2260_v20 = vmax.f32 %v2132_v16, 0.0 }
 0x159   : > { %2326 = vst [vmem:[%s3252_s7 + $0x158] sm:$0xff] %v2198_v17  ;;  %2390 = vst [vmem:[%s3252_s7 + $0x358] sm:$0xff] %v2262_v18 }
 0x15a   : > { %2324 = vst [vmem:[%s3252_s7 + $0x148] sm:$0xff] %v2196_v19  ;;  %2388 = vst [vmem:[%s3252_s7 + $0x348] sm:$0xff] %v2260_v20  ;;  %v2757_v21 = vpop.f32.mrb[44].mxu0  ;;  %v2821_v22 = vpop.f32.mrb[44].mxu1 }
 0x15b   : > { %v2073_v23 = vadd.f32 %v2757_v21, %v3240_v8  ;;  %v2137_v24 = vadd.f32 %v2821_v22, %v3240_v8  ;;  %v1298_v25 = vpop.f32.mrb[45].mxu0  ;;  %v1554_v26 = vpop.f32.mrb[45].mxu1 }
 0x15c   : > { %v2071_v27 = vadd.f32 %v3240_v8, %v1298_v25  ;;  %v2135_v28 = vadd.f32 %v3240_v8, %v1554_v26  ;;  %v2758_v29 = vpop.f32.mrb[46].mxu0  ;;  %v2822_v30 = vpop.f32.mrb[46].mxu1 }
 0x15d   : > { %v2201_v31 = vmax.f32 %v2073_v23, 0.0  ;;  %v2265_v32 = vmax.f32 %v2137_v24, 0.0  ;;  %v2074_v33 = vadd.f32 %v2758_v29, %v3240_v8  ;;  %v2138_v34 = vadd.f32 %v2822_v30, %v3240_v8  ;;  %v1301_v35 = vpop.f32.mrb[47].mxu0  ;;  %v1557_v36 = vpop.f32.mrb[47].mxu1 }
 0x15e   : > { %v2199_v37 = vmax.f32 %v2071_v27, 0.0  ;;  %v2263_v38 = vmax.f32 %v2135_v28, 0.0  ;;  %v2072_v39 = vadd.f32 %v3240_v8, %v1301_v35  ;;  %v2136_v40 = vadd.f32 %v3240_v8, %v1557_v36 }
 0x15f   : > { %2329 = vst [vmem:[%s3252_s7 + $0x170] sm:$0xff] %v2201_v31  ;;  %2393 = vst [vmem:[%s3252_s7 + $0x370] sm:$0xff] %v2265_v32  ;;  %v2202_v41 = vmax.f32 %v2074_v33, 0.0  ;;  %v2266_v42 = vmax.f32 %v2138_v34, 0.0 }
 0x160   : > { %2327 = vst [vmem:[%s3252_s7 + $0x160] sm:$0xff] %v2199_v37  ;;  %2391 = vst [vmem:[%s3252_s7 + $0x360] sm:$0xff] %v2263_v38  ;;  %v2200_v43 = vmax.f32 %v2072_v39, 0.0  ;;  %v2264_v44 = vmax.f32 %v2136_v40, 0.0 }
 0x161   : > { %2330 = vst [vmem:[%s3252_s7 + $0x178] sm:$0xff] %v2202_v41  ;;  %2394 = vst [vmem:[%s3252_s7 + $0x378] sm:$0xff] %v2266_v42 }
 0x162   : > { %2328 = vst [vmem:[%s3252_s7 + $0x168] sm:$0xff] %v2200_v43  ;;  %2392 = vst [vmem:[%s3252_s7 + $0x368] sm:$0xff] %v2264_v44  ;;  %v2761_v45 = vpop.f32.mrb[48].mxu0  ;;  %v2825_v46 = vpop.f32.mrb[48].mxu1 }
 0x163   : > { %v2077_v47 = vadd.f32 %v2761_v45, %v3240_v8  ;;  %v2141_v48 = vadd.f32 %v2825_v46, %v3240_v8  ;;  %v1314_v49 = vpop.f32.mrb[49].mxu0  ;;  %v1570_v50 = vpop.f32.mrb[49].mxu1 }
 0x164   : > { %v2075_v51 = vadd.f32 %v3240_v8, %v1314_v49  ;;  %v2139_v52 = vadd.f32 %v3240_v8, %v1570_v50  ;;  %v2762_v53 = vpop.f32.mrb[50].mxu0  ;;  %v2826_v54 = vpop.f32.mrb[50].mxu1 }
 0x165   : > { %v2205_v55 = vmax.f32 %v2077_v47, 0.0  ;;  %v2269_v56 = vmax.f32 %v2141_v48, 0.0  ;;  %v2078_v57 = vadd.f32 %v2762_v53, %v3240_v8  ;;  %v2142_v58 = vadd.f32 %v2826_v54, %v3240_v8  ;;  %v1317_v59 = vpop.f32.mrb[51].mxu0  ;;  %v1573_v60 = vpop.f32.mrb[51].mxu1 }
 0x166   : > { %v2203_v61 = vmax.f32 %v2075_v51, 0.0  ;;  %v2267_v62 = vmax.f32 %v2139_v52, 0.0  ;;  %v2076_v63 = vadd.f32 %v3240_v8, %v1317_v59  ;;  %v2140_v0 = vadd.f32 %v3240_v8, %v1573_v60 }
 0x167   : > { %2333 = vst [vmem:[%s3252_s7 + $0x190] sm:$0xff] %v2205_v55  ;;  %2397 = vst [vmem:[%s3252_s7 + $0x390] sm:$0xff] %v2269_v56  ;;  %v2206_v1 = vmax.f32 %v2078_v57, 0.0  ;;  %v2270_v2 = vmax.f32 %v2142_v58, 0.0 }
 0x168   : > { %2331 = vst [vmem:[%s3252_s7 + $0x180] sm:$0xff] %v2203_v61  ;;  %2395 = vst [vmem:[%s3252_s7 + $0x380] sm:$0xff] %v2267_v62  ;;  %v2204_v3 = vmax.f32 %v2076_v63, 0.0  ;;  %v2268_v4 = vmax.f32 %v2140_v0, 0.0 }
 0x169   : > { %2334 = vst [vmem:[%s3252_s7 + $0x198] sm:$0xff] %v2206_v1  ;;  %2398 = vst [vmem:[%s3252_s7 + $0x398] sm:$0xff] %v2270_v2 }
 0x16a   : > { %2332 = vst [vmem:[%s3252_s7 + $0x188] sm:$0xff] %v2204_v3  ;;  %2396 = vst [vmem:[%s3252_s7 + $0x388] sm:$0xff] %v2268_v4  ;;  %v2765_v5 = vpop.f32.mrb[52].mxu0  ;;  %v2829_v6 = vpop.f32.mrb[52].mxu1 }
 0x16b   : > { %v2081_v7 = vadd.f32 %v2765_v5, %v3240_v8  ;;  %v2145_v9 = vadd.f32 %v2829_v6, %v3240_v8  ;;  %v1330_v10 = vpop.f32.mrb[53].mxu0  ;;  %v1586_v11 = vpop.f32.mrb[53].mxu1 }
 0x16c   : > { %v2079_v12 = vadd.f32 %v3240_v8, %v1330_v10  ;;  %v2143_v13 = vadd.f32 %v3240_v8, %v1586_v11  ;;  %v2766_v14 = vpop.f32.mrb[54].mxu0  ;;  %v2830_v15 = vpop.f32.mrb[54].mxu1 }
 0x16d   : > { %v2209_v16 = vmax.f32 %v2081_v7, 0.0  ;;  %v2273_v17 = vmax.f32 %v2145_v9, 0.0  ;;  %v2082_v18 = vadd.f32 %v2766_v14, %v3240_v8  ;;  %v2146_v19 = vadd.f32 %v2830_v15, %v3240_v8  ;;  %v1333_v20 = vpop.f32.mrb[55].mxu0  ;;  %v1589_v21 = vpop.f32.mrb[55].mxu1 }
 0x16e   : > { %v2207_v22 = vmax.f32 %v2079_v12, 0.0  ;;  %v2271_v23 = vmax.f32 %v2143_v13, 0.0  ;;  %v2080_v24 = vadd.f32 %v3240_v8, %v1333_v20  ;;  %v2144_v25 = vadd.f32 %v3240_v8, %v1589_v21 }
 0x16f   : > { %2337 = vst [vmem:[%s3252_s7 + $0x1b0] sm:$0xff] %v2209_v16  ;;  %2401 = vst [vmem:[%s3252_s7 + $0x3b0] sm:$0xff] %v2273_v17  ;;  %v2210_v26 = vmax.f32 %v2082_v18, 0.0  ;;  %v2274_v27 = vmax.f32 %v2146_v19, 0.0 }
 0x170   : > { %2335 = vst [vmem:[%s3252_s7 + $0x1a0] sm:$0xff] %v2207_v22  ;;  %2399 = vst [vmem:[%s3252_s7 + $0x3a0] sm:$0xff] %v2271_v23  ;;  %v2208_v28 = vmax.f32 %v2080_v24, 0.0  ;;  %v2272_v29 = vmax.f32 %v2144_v25, 0.0 }
 0x171   : > { %2338 = vst [vmem:[%s3252_s7 + $0x1b8] sm:$0xff] %v2210_v26  ;;  %2402 = vst [vmem:[%s3252_s7 + $0x3b8] sm:$0xff] %v2274_v27 }
 0x172   : > { %2336 = vst [vmem:[%s3252_s7 + $0x1a8] sm:$0xff] %v2208_v28  ;;  %2400 = vst [vmem:[%s3252_s7 + $0x3a8] sm:$0xff] %v2272_v29  ;;  %v2769_v30 = vpop.f32.mrb[56].mxu0  ;;  %v2833_v31 = vpop.f32.mrb[56].mxu1 }
 0x173   : > { %v2085_v32 = vadd.f32 %v2769_v30, %v3240_v8  ;;  %v2149_v33 = vadd.f32 %v2833_v31, %v3240_v8  ;;  %v1346_v34 = vpop.f32.mrb[57].mxu0  ;;  %v1602_v35 = vpop.f32.mrb[57].mxu1 }
 0x174   : > { %v2083_v36 = vadd.f32 %v3240_v8, %v1346_v34  ;;  %v2147_v37 = vadd.f32 %v3240_v8, %v1602_v35  ;;  %v2770_v38 = vpop.f32.mrb[58].mxu0  ;;  %v2834_v39 = vpop.f32.mrb[58].mxu1 }
 0x175   : > { %v2213_v40 = vmax.f32 %v2085_v32, 0.0  ;;  %v2277_v41 = vmax.f32 %v2149_v33, 0.0  ;;  %v2086_v42 = vadd.f32 %v2770_v38, %v3240_v8  ;;  %v2150_v43 = vadd.f32 %v2834_v39, %v3240_v8  ;;  %v1349_v44 = vpop.f32.mrb[59].mxu0  ;;  %v1605_v45 = vpop.f32.mrb[59].mxu1 }
 0x176   : > { %v2211_v46 = vmax.f32 %v2083_v36, 0.0  ;;  %v2275_v47 = vmax.f32 %v2147_v37, 0.0  ;;  %v2084_v48 = vadd.f32 %v3240_v8, %v1349_v44  ;;  %v2148_v49 = vadd.f32 %v3240_v8, %v1605_v45 }
 0x177   : > { %2341 = vst [vmem:[%s3252_s7 + $0x1d0] sm:$0xff] %v2213_v40  ;;  %2405 = vst [vmem:[%s3252_s7 + $0x3d0] sm:$0xff] %v2277_v41  ;;  %v2214_v50 = vmax.f32 %v2086_v42, 0.0  ;;  %v2278_v51 = vmax.f32 %v2150_v43, 0.0 }
 0x178   : > { %2339 = vst [vmem:[%s3252_s7 + $0x1c0] sm:$0xff] %v2211_v46  ;;  %2403 = vst [vmem:[%s3252_s7 + $0x3c0] sm:$0xff] %v2275_v47  ;;  %v2212_v52 = vmax.f32 %v2084_v48, 0.0  ;;  %v2276_v53 = vmax.f32 %v2148_v49, 0.0 }
 0x179   : > { %2342 = vst [vmem:[%s3252_s7 + $0x1d8] sm:$0xff] %v2214_v50  ;;  %2406 = vst [vmem:[%s3252_s7 + $0x3d8] sm:$0xff] %v2278_v51 }
 0x17a   : > { %2340 = vst [vmem:[%s3252_s7 + $0x1c8] sm:$0xff] %v2212_v52  ;;  %2404 = vst [vmem:[%s3252_s7 + $0x3c8] sm:$0xff] %v2276_v53  ;;  %v2773_v54 = vpop.f32.mrb[60].mxu0  ;;  %v2837_v55 = vpop.f32.mrb[60].mxu1 }
 0x17b   : > { %v2089_v56 = vadd.f32 %v2773_v54, %v3240_v8  ;;  %v2153_v57 = vadd.f32 %v2837_v55, %v3240_v8  ;;  %v1362_v58 = vpop.f32.mrb[61].mxu0  ;;  %v1618_v59 = vpop.f32.mrb[61].mxu1 }
 0x17c   : > { %v2087_v60 = vadd.f32 %v3240_v8, %v1362_v58  ;;  %v2151_v61 = vadd.f32 %v3240_v8, %v1618_v59  ;;  %v2774_v62 = vpop.f32.mrb[62].mxu0  ;;  %v2838_v63 = vpop.f32.mrb[62].mxu1 }
 0x17d   : > { %v2217_v0 = vmax.f32 %v2089_v56, 0.0  ;;  %v2281_v1 = vmax.f32 %v2153_v57, 0.0  ;;  %v2090_v2 = vadd.f32 %v2774_v62, %v3240_v8  ;;  %v2154_v3 = vadd.f32 %v2838_v63, %v3240_v8  ;;  %v1365_v4 = vpop.f32.mrb[63].mxu0  ;;  %v1621_v5 = vpop.f32.mrb[63].mxu1 }
 0x17e   : > { %v2215_v6 = vmax.f32 %v2087_v60, 0.0  ;;  %v2279_v7 = vmax.f32 %v2151_v61, 0.0  ;;  %v2088_v9 = vadd.f32 %v3240_v8, %v1365_v4  ;;  %v2152_v10 = vadd.f32 %v3240_v8, %v1621_v5 }
 0x17f   : > { %2345 = vst [vmem:[%s3252_s7 + $0x1f0] sm:$0xff] %v2217_v0  ;;  %2409 = vst [vmem:[%s3252_s7 + $0x3f0] sm:$0xff] %v2281_v1  ;;  %v2218_v11 = vmax.f32 %v2090_v2, 0.0  ;;  %v2282_v12 = vmax.f32 %v2154_v3, 0.0 }
 0x180   : > { %2343 = vst [vmem:[%s3252_s7 + $0x1e0] sm:$0xff] %v2215_v6  ;;  %2407 = vst [vmem:[%s3252_s7 + $0x3e0] sm:$0xff] %v2279_v7  ;;  %v2216_v13 = vmax.f32 %v2088_v9, 0.0  ;;  %v2280_v14 = vmax.f32 %v2152_v10, 0.0 }
 0x181   : > { %2346 = vst [vmem:[%s3252_s7 + $0x1f8] sm:$0xff] %v2218_v11  ;;  %2410 = vst [vmem:[%s3252_s7 + $0x3f8] sm:$0xff] %v2282_v12 }
 0x182   : > { %2344 = vst [vmem:[%s3252_s7 + $0x1e8] sm:$0xff] %v2216_v13  ;;  %2408 = vst [vmem:[%s3252_s7 + $0x3e8] sm:$0xff] %v2280_v14 }
 0x183   : > { %2997 = shalt.err (!%p2994_p5)
}
 0x184   : > { %s2998_s27 = scalar_lea.hbm %s3501_s11, 16384  ;;  %s3002_s30 = scalar_lea.hbm %s3562_s3, 131072 }
 0x185   : > { %p2999_p6 = scmp.ne.s32.totalorder %s3501_s11, %s2998_s27  ;;  %p3003_p10 = scmp.lt.u32.totalorder %s3501_s11, %s3562_s3 }
 0x186   : > { %p3004_p11 = scmp.lt.u32.totalorder %s3002_s30, %s2998_s27  ;;  %p3006_p13 = scmp.lt.u32.totalorder %s2998_s27, %s3501_s11 }
 0x187   : > { %p3000_p7 = pnand %p2999_p6, %p3127_p4 }
 0x188   : > { %p3005_p12 = por %p3004_p11, %p3003_p10 }
 0x189   : > { %p3001_p9 = pneg %p3000_p7 }
 0x18a   : > { %p3007_p0 = por %p3006_p13, %p3005_p12 }
 0x18c   : > { %p3008_p1 = pnand %p3007_p0, %p3001_p9 }
 0x18e   : > { %3011 = shalt.err (!%p3008_p1)
}
 0x18f   : > { %s3065_s6 = smov 128   ;;  %s3066_s7 = smov 8  }
 0x190   : > { %2855 = dma.vmem_to_hbm [thread:$0]  (%p3127_p4), %s3503_s9, 16384, %s3501_s11, %s3513_s18, %s3065_s6, %s3065_s6, %s3066_s7  }
 0x191 PF: > { %p2861_p2 = scmp.ge.s32.totalorder %s3062_s17, 2  ;;  %s2441_s8 = sand.u32 1, %s3042_s12  }
 0x192   : > { %s2442_s15 = scalar_lea.sflag [#allocation4], %s2441_s8 }
 0x193   : > { %p2858_p3 = pnand %p2861_p2, %p3134_p8 }
 0x195   : > { %3037 = dma.done.wait (!%p2858_p3), %s2442_s15, 16384  }
 0x196   : > { %3039 = vsyncadd (!%p2858_p3), %s2442_s15, 4294950912  ;;  %s16_s17 = sadd.s32 1, %s3062_s17   ;;  %s3565_s12 = smov %s3046_s13 }
 0x197   : > { %p13_p5 = scmp.ge.s32.totalorder %s16_s17, 10   ;;  %s3566_s13 = smov %s3050_s14 }
 0x198   : > { %s3567_s14 = smov %s3140_s25  ;;  %s3568_s15 = smov %s3058_s16 }
 0x199   : > { %s3569_s16 = smov %s3571_s20  ;;  %15 = sbr.rel (!%p13_p5) target bundleno = 4 (0x4), region = 81 }
 0x1a0   :  { %2447 = vsyncpa [#allocation4], 1 }
 0x1a1   :  { %2449 = vsyncpa [#allocation4 + $0x1], 1 }

</bundles_post_ra>
